<compile_context>
chip_gen: v6e
topology: v6e:2x2x1
jax: 0.10.0
libtpu: 0.0.40
codegen_flags: <defaults>
</compile_context>

<pallas_src>
import functools

import jax
import jax.numpy as jnp
from jax.experimental import pallas as pl
from jax.experimental.pallas import tpu as pltpu

DTYPE = jnp.float32


def _round_up(x, m):
    return (x + m - 1) // m * m


def _largest_divisor_leq(n, cap):
    for d in range(min(n, cap), 0, -1):
        if n % d == 0:
            return d
    return 1


def _choose_time_tile(T):
    # Largest lane-aligned (multiple of 128) divisor of T up to 2048, else full T.
    for tt in range(2048, 0, -128):
        if tt <= T and T % tt == 0:
            return tt
    return T


def init_params(key, in_dim, emb_dim, dtype=DTYPE):
    """Deterministic init mimicking nn.Linear default (uniform(-1/sqrt(fan_in), ...))."""
    dims = [(in_dim, 20), (20, 20), (20, 20), (20, 10), (10, emb_dim), (10, emb_dim)]
    params = []
    for i, (fin, fout) in enumerate(dims):
        kw, kb = jax.random.split(jax.random.fold_in(key, i))
        bound = 1.0 / (fin ** 0.5)
        w = jax.random.uniform(kw, (fin, fout), dtype, minval=-bound, maxval=bound)
        b = jax.random.uniform(kb, (1, fout), dtype, minval=-bound, maxval=bound)
        params += [w, b]
    return tuple(params)


def _pack_params(params, dtype):
    """Pack transposed (output-major) weights into one slab + biases into a column slab.

    The mean and var heads are fused into a single (2*emb_dim, 10) block so the
    kernel does one head matmul instead of two.
    Returns (w_slab, b_slab, row_offsets, (rows, cols) per layer) -- offsets and
    shapes are static Python ints.
    """
    w1, b1, w2, b2, w3, b3, w4, b4, wm, bm, wv, bv = params
    wts = [w1.T, w2.T, w3.T, w4.T, jnp.concatenate([wm.T, wv.T], axis=0)]
    bts = [b1.reshape(-1, 1), b2.reshape(-1, 1), b3.reshape(-1, 1), b4.reshape(-1, 1),
           jnp.concatenate([bm.reshape(-1, 1), bv.reshape(-1, 1)], axis=0)]
    offsets, shapes = [], []
    r = 0
    for wt in wts:
        offsets.append(r)
        shapes.append((int(wt.shape[0]), int(wt.shape[1])))
        r += _round_up(int(wt.shape[0]), 8)   # sublane-aligned layer offsets
    rows_total = r
    cols_max = max(s[1] for s in shapes)
    w_slab = jnp.zeros((rows_total, cols_max), dtype)
    b_slab = jnp.zeros((rows_total, 1), dtype)
    for off, (rows, cols), wt, bt in zip(offsets, shapes, wts, bts):
        w_slab = w_slab.at[off:off + rows, :cols].set(wt.astype(dtype))
        b_slab = b_slab.at[off:off + rows, :].set(bt.astype(dtype))
    return w_slab, b_slab, tuple(offsets), tuple(shapes)


def _make_kernel(tb, offsets, shapes, emb_dim):
    """Kernel over blocks x:(tb, in_dim, tt) -> mean/var/z:(tb, emb_dim, tt)."""

    def kernel(x_ref, eps_ref, w_ref, b_ref, mean_ref, var_ref, z_ref):
        w_all = w_ref[...]          # (R, Cmax)  tiny, resident across the grid
        b_all = b_ref[...]          # (R, 1)
        ws = [w_all[off:off + rows, :cols] for off, (rows, cols) in zip(offsets, shapes)]
        bs = [b_all[off:off + rows, :] for off, (rows, _) in zip(offsets, shapes)]

        for b in range(tb):         # static unrolled loop over batch elements
            h = x_ref[b]            # (in_dim, tt): features on sublanes, time on lanes
            for li in range(4):     # encoder: 4 x (Linear + ReLU)
                h = jnp.maximum(
                    jnp.dot(ws[li], h, preferred_element_type=jnp.float32) + bs[li], 0.0)
            # fused mean|var head: (2*emb_dim, tt)
            mv = jnp.dot(ws[4], h, preferred_element_type=jnp.float32) + bs[4]
            mean = mv[:emb_dim, :]
            var = mv[emb_dim:, :]
            mean_ref[b] = mean.astype(mean_ref.dtype)
            var_ref[b] = var.astype(var_ref.dtype)
            z_ref[b] = (mean + var * eps_ref[b]).astype(z_ref.dtype)

    return kernel


@functools.partial(jax.jit, static_argnames=("emb_dim", "tb"))
def mlp_emb_kin_forward(data, eps, params, *, emb_dim, tb=4):
    """data: (P, C, in_dim, T) float32.  eps: (P, C, emb_dim, T) uniform noise.

    Returns (mean, var, reparams), each (P, C, emb_dim, T), matching the torch module.
    """
    P, C, in_dim, T = data.shape
    B = P * C
    tb_eff = _largest_divisor_leq(B, tb)
    tt = _choose_time_tile(T)

    # Free reshapes only -- no transposes anywhere (time stays on the lane axis).
    x = data.reshape(B, in_dim, T)
    eps_b = eps.reshape(B, emb_dim, T)

    w_slab, b_slab, offsets, shapes = _pack_params(params, data.dtype)

    grid = (B // tb_eff, T // tt)
    x_spec = pl.BlockSpec((tb_eff, in_dim, tt), lambda ib, it: (ib, 0, it))
    eps_spec = pl.BlockSpec((tb_eff, emb_dim, tt), lambda ib, it: (ib, 0, it))
    w_spec = pl.BlockSpec(w_slab.shape, lambda ib, it: (0, 0))
    b_spec = pl.BlockSpec(b_slab.shape, lambda ib, it: (0, 0))
    out_spec = pl.BlockSpec((tb_eff, emb_dim, tt), lambda ib, it: (ib, 0, it))

    out_sds = jax.ShapeDtypeStruct((B, emb_dim, T), data.dtype)

    mean_b, var_b, z_b = pl.pallas_call(
        _make_kernel(tb_eff, offsets, shapes, emb_dim),
        out_shape=(out_sds, out_sds, out_sds),
        grid_spec=pltpu.PrefetchScalarGridSpec(
            num_scalar_prefetch=0,
            grid=grid,
            in_specs=[x_spec, eps_spec, w_spec, b_spec],
            out_specs=[out_spec, out_spec, out_spec],
        ),
        compiler_params=pltpu.CompilerParams(
            dimension_semantics=("parallel", "parallel")),
    )(x, eps_b, w_slab, b_slab)

    shape_out = (P, C, emb_dim, T)
    return (mean_b.reshape(shape_out), var_b.reshape(shape_out), z_b.reshape(shape_out))


def _reference(data, eps, params):
    w1, b1, w2, b2, w3, b3, w4, b4, wm, bm, wv, bv = params
    x = jnp.transpose(data, (0, 1, 3, 2))
    h = jax.nn.relu(x @ w1 + b1[0])
    h = jax.nn.relu(h @ w2 + b2[0])
    h = jax.nn.relu(h @ w3 + b3[0])
    h = jax.nn.relu(h @ w4 + b4[0])
    mean = jnp.transpose(h @ wm + bm[0], (0, 1, 3, 2))
    var = jnp.transpose(h @ wv + bv[0], (0, 1, 3, 2))
    z = mean + var * eps
    return mean, var, z


if __name__ == "__main__":
    key = jax.random.PRNGKey(0)
    k_data, k_eps, k_params = jax.random.split(key, 3)

    P, C, in_dim, T = 2, 4, 16, 16
    emb_dim = 1

    data = jax.random.normal(k_data, (P, C, in_dim, T), DTYPE)
    # torch.rand -> uniform [0, 1); passed explicitly for deterministic parity.
    eps = jax.random.uniform(k_eps, (P, C, emb_dim, T), DTYPE)
    params = init_params(k_params, in_dim, emb_dim)

    mean, var, z = mlp_emb_kin_forward(data, eps, params, emb_dim=emb_dim)
    jax.block_until_ready((mean, var, z))

    mean_r, var_r, z_r = _reference(data, eps, params)
    assert mean.shape == (P, C, emb_dim, T)
    assert var.shape == (P, C, emb_dim, T)
    assert z.shape == (P, C, emb_dim, T)
    assert jnp.allclose(mean, mean_r, atol=1e-5, rtol=1e-5)
    assert jnp.allclose(var, var_r, atol=1e-5, rtol=1e-5)
    assert jnp.allclose(z, z_r, atol=1e-5, rtol=1e-5)

    print("KERNEL_OK")
</pallas_src>

<mosaic_0001>
module attributes {stable_mosaic.version = 11 : i64} {
  func.func @kernel(%arg0: i32, %arg1: i32, %arg2: memref<4x16x16xf32, #tpu.memory_space<vmem>>, %arg3: memref<4x1x16xf32, #tpu.memory_space<vmem>>, %arg4: memref<96x20xf32, #tpu.memory_space<vmem>>, %arg5: memref<96x1xf32, #tpu.memory_space<vmem>>, %arg6: memref<4x1x16xf32, #tpu.memory_space<vmem>>, %arg7: memref<4x1x16xf32, #tpu.memory_space<vmem>>, %arg8: memref<4x1x16xf32, #tpu.memory_space<vmem>>) attributes {dimension_semantics = [#tpu.dimension_semantics<parallel>, #tpu.dimension_semantics<parallel>], iteration_bounds = array<i64: 2, 1>, scalar_prefetch = 0 : i64, scratch_operands = 0 : i64, tpu.core_type = #tpu.core_type<tc>, window_params = [{transform_indices = @transform_0, window_bounds = array<i64: 4, 16, 16>}, {transform_indices = @transform_1, window_bounds = array<i64: 4, 1, 16>}, {pipeline_mode = #tpu.pipeline_mode<synchronous>, transform_indices = @transform_2, window_bounds = array<i64: 96, 20>}, {pipeline_mode = #tpu.pipeline_mode<synchronous>, transform_indices = @transform_3, window_bounds = array<i64: 96, 1>}, {transform_indices = @transform_4, window_bounds = array<i64: 4, 1, 16>}, {transform_indices = @transform_5, window_bounds = array<i64: 4, 1, 16>}, {transform_indices = @transform_6, window_bounds = array<i64: 4, 1, 16>}]} {
    %c0 = arith.constant 0 : index
    %c0_0 = arith.constant 0 : index
    %0 = vector.load %arg4[%c0, %c0_0] : memref<96x20xf32, #tpu.memory_space<vmem>>, vector<96x20xf32>
    %c0_1 = arith.constant 0 : index
    %c0_2 = arith.constant 0 : index
    %1 = vector.load %arg5[%c0_1, %c0_2] : memref<96x1xf32, #tpu.memory_space<vmem>>, vector<96x1xf32>
    %2 = vector.extract_strided_slice %0 {offsets = [0, 0], sizes = [20, 16], strides = [1, 1]} : vector<96x20xf32> to vector<20x16xf32>
    %3 = vector.extract_strided_slice %0 {offsets = [24, 0], sizes = [20, 20], strides = [1, 1]} : vector<96x20xf32> to vector<20x20xf32>
    %4 = vector.extract_strided_slice %0 {offsets = [48, 0], sizes = [20, 20], strides = [1, 1]} : vector<96x20xf32> to vector<20x20xf32>
    %5 = vector.extract_strided_slice %0 {offsets = [72, 0], sizes = [10, 20], strides = [1, 1]} : vector<96x20xf32> to vector<10x20xf32>
    %6 = vector.extract_strided_slice %0 {offsets = [88, 0], sizes = [2, 10], strides = [1, 1]} : vector<96x20xf32> to vector<2x10xf32>
    %7 = vector.extract_strided_slice %1 {offsets = [0, 0], sizes = [20, 1], strides = [1, 1]} : vector<96x1xf32> to vector<20x1xf32>
    %8 = vector.extract_strided_slice %1 {offsets = [24, 0], sizes = [20, 1], strides = [1, 1]} : vector<96x1xf32> to vector<20x1xf32>
    %9 = vector.extract_strided_slice %1 {offsets = [48, 0], sizes = [20, 1], strides = [1, 1]} : vector<96x1xf32> to vector<20x1xf32>
    %10 = vector.extract_strided_slice %1 {offsets = [72, 0], sizes = [10, 1], strides = [1, 1]} : vector<96x1xf32> to vector<10x1xf32>
    %11 = vector.extract_strided_slice %1 {offsets = [88, 0], sizes = [2, 1], strides = [1, 1]} : vector<96x1xf32> to vector<2x1xf32>
    %c0_3 = arith.constant 0 : index
    %c0_4 = arith.constant 0 : index
    %c0_5 = arith.constant 0 : index
    %12 = vector.load %arg2[%c0_3, %c0_4, %c0_5] : memref<4x16x16xf32, #tpu.memory_space<vmem>>, vector<1x16x16xf32>
    %13 = vector.shape_cast %12 : vector<1x16x16xf32> to vector<16x16xf32>
    %cst = arith.constant dense<0.000000e+00> : vector<20x16xf32>
    %14 = tpu.matmul %2, %13, %cst {dimension_numbers = #tpu.dot_dimension_numbers<[1], [0], [0], [1], [0, 0, 1, 1], [], []>} : vector<20x16xf32>, vector<16x16xf32>, vector<20x16xf32> -> vector<20x16xf32>
    %15 = vector.broadcast %7 : vector<20x1xf32> to vector<20x16xf32>
    %16 = arith.addf %14, %15 : vector<20x16xf32>
    %cst_6 = arith.constant 0.000000e+00 : f32
    %17 = vector.broadcast %cst_6 : f32 to vector<20x16xf32>
    %18 = arith.maximumf %16, %17 : vector<20x16xf32>
    %cst_7 = arith.constant dense<0.000000e+00> : vector<20x16xf32>
    %19 = tpu.matmul %3, %18, %cst_7 {dimension_numbers = #tpu.dot_dimension_numbers<[1], [0], [0], [1], [0, 0, 1, 1], [], []>} : vector<20x20xf32>, vector<20x16xf32>, vector<20x16xf32> -> vector<20x16xf32>
    %20 = vector.broadcast %8 : vector<20x1xf32> to vector<20x16xf32>
    %21 = arith.addf %19, %20 : vector<20x16xf32>
    %cst_8 = arith.constant 0.000000e+00 : f32
    %22 = vector.broadcast %cst_8 : f32 to vector<20x16xf32>
    %23 = arith.maximumf %21, %22 : vector<20x16xf32>
    %cst_9 = arith.constant dense<0.000000e+00> : vector<20x16xf32>
    %24 = tpu.matmul %4, %23, %cst_9 {dimension_numbers = #tpu.dot_dimension_numbers<[1], [0], [0], [1], [0, 0, 1, 1], [], []>} : vector<20x20xf32>, vector<20x16xf32>, vector<20x16xf32> -> vector<20x16xf32>
    %25 = vector.broadcast %9 : vector<20x1xf32> to vector<20x16xf32>
    %26 = arith.addf %24, %25 : vector<20x16xf32>
    %cst_10 = arith.constant 0.000000e+00 : f32
    %27 = vector.broadcast %cst_10 : f32 to vector<20x16xf32>
    %28 = arith.maximumf %26, %27 : vector<20x16xf32>
    %cst_11 = arith.constant dense<0.000000e+00> : vector<10x16xf32>
    %29 = tpu.matmul %5, %28, %cst_11 {dimension_numbers = #tpu.dot_dimension_numbers<[1], [0], [0], [1], [0, 0, 1, 1], [], []>} : vector<10x20xf32>, vector<20x16xf32>, vector<10x16xf32> -> vector<10x16xf32>
    %30 = vector.broadcast %10 : vector<10x1xf32> to vector<10x16xf32>
    %31 = arith.addf %29, %30 : vector<10x16xf32>
    %cst_12 = arith.constant 0.000000e+00 : f32
    %32 = vector.broadcast %cst_12 : f32 to vector<10x16xf32>
    %33 = arith.maximumf %31, %32 : vector<10x16xf32>
    %cst_13 = arith.constant dense<0.000000e+00> : vector<2x16xf32>
    %34 = tpu.matmul %6, %33, %cst_13 {dimension_numbers = #tpu.dot_dimension_numbers<[1], [0], [0], [1], [0, 0, 1, 1], [], []>} : vector<2x10xf32>, vector<10x16xf32>, vector<2x16xf32> -> vector<2x16xf32>
    %35 = vector.broadcast %11 : vector<2x1xf32> to vector<2x16xf32>
    %36 = arith.addf %34, %35 : vector<2x16xf32>
    %37 = vector.extract_strided_slice %36 {offsets = [0, 0], sizes = [1, 16], strides = [1, 1]} : vector<2x16xf32> to vector<1x16xf32>
    %38 = vector.extract_strided_slice %36 {offsets = [1, 0], sizes = [1, 16], strides = [1, 1]} : vector<2x16xf32> to vector<1x16xf32>
    %c0_14 = arith.constant 0 : index
    %c0_15 = arith.constant 0 : index
    %c0_16 = arith.constant 0 : index
    %39 = vector.load %arg6[%c0_14, %c0_15, %c0_16] : memref<4x1x16xf32, #tpu.memory_space<vmem>>, vector<1x1x16xf32>
    %40 = vector.shape_cast %39 : vector<1x1x16xf32> to vector<1x16xf32>
    %41 = vector.shape_cast %37 : vector<1x16xf32> to vector<1x1x16xf32>
    tpu.vector_store %arg6[%c0_14, %c0_15, %c0_16], %41 {strides = array<i32>} : memref<4x1x16xf32, #tpu.memory_space<vmem>>, vector<1x1x16xf32>,
    %c0_17 = arith.constant 0 : index
    %c0_18 = arith.constant 0 : index
    %c0_19 = arith.constant 0 : index
    %42 = vector.load %arg7[%c0_17, %c0_18, %c0_19] : memref<4x1x16xf32, #tpu.memory_space<vmem>>, vector<1x1x16xf32>
    %43 = vector.shape_cast %42 : vector<1x1x16xf32> to vector<1x16xf32>
    %44 = vector.shape_cast %38 : vector<1x16xf32> to vector<1x1x16xf32>
    tpu.vector_store %arg7[%c0_17, %c0_18, %c0_19], %44 {strides = array<i32>} : memref<4x1x16xf32, #tpu.memory_space<vmem>>, vector<1x1x16xf32>,
    %c0_20 = arith.constant 0 : index
    %c0_21 = arith.constant 0 : index
    %c0_22 = arith.constant 0 : index
    %45 = vector.load %arg3[%c0_20, %c0_21, %c0_22] : memref<4x1x16xf32, #tpu.memory_space<vmem>>, vector<1x1x16xf32>
    %46 = vector.shape_cast %45 : vector<1x1x16xf32> to vector<1x16xf32>
    %47 = arith.mulf %38, %46 : vector<1x16xf32>
    %48 = arith.addf %37, %47 : vector<1x16xf32>
    %c0_23 = arith.constant 0 : index
    %c0_24 = arith.constant 0 : index
    %c0_25 = arith.constant 0 : index
    %49 = vector.load %arg8[%c0_23, %c0_24, %c0_25] : memref<4x1x16xf32, #tpu.memory_space<vmem>>, vector<1x1x16xf32>
    %50 = vector.shape_cast %49 : vector<1x1x16xf32> to vector<1x16xf32>
    %51 = vector.shape_cast %48 : vector<1x16xf32> to vector<1x1x16xf32>
    tpu.vector_store %arg8[%c0_23, %c0_24, %c0_25], %51 {strides = array<i32>} : memref<4x1x16xf32, #tpu.memory_space<vmem>>, vector<1x1x16xf32>,
    %c1 = arith.constant 1 : index
    %c0_26 = arith.constant 0 : index
    %c0_27 = arith.constant 0 : index
    %52 = vector.load %arg2[%c1, %c0_26, %c0_27] : memref<4x16x16xf32, #tpu.memory_space<vmem>>, vector<1x16x16xf32>
    %53 = vector.shape_cast %52 : vector<1x16x16xf32> to vector<16x16xf32>
    %cst_28 = arith.constant dense<0.000000e+00> : vector<20x16xf32>
    %54 = tpu.matmul %2, %53, %cst_28 {dimension_numbers = #tpu.dot_dimension_numbers<[1], [0], [0], [1], [0, 0, 1, 1], [], []>} : vector<20x16xf32>, vector<16x16xf32>, vector<20x16xf32> -> vector<20x16xf32>
    %55 = vector.broadcast %7 : vector<20x1xf32> to vector<20x16xf32>
    %56 = arith.addf %54, %55 : vector<20x16xf32>
    %cst_29 = arith.constant 0.000000e+00 : f32
    %57 = vector.broadcast %cst_29 : f32 to vector<20x16xf32>
    %58 = arith.maximumf %56, %57 : vector<20x16xf32>
    %cst_30 = arith.constant dense<0.000000e+00> : vector<20x16xf32>
    %59 = tpu.matmul %3, %58, %cst_30 {dimension_numbers = #tpu.dot_dimension_numbers<[1], [0], [0], [1], [0, 0, 1, 1], [], []>} : vector<20x20xf32>, vector<20x16xf32>, vector<20x16xf32> -> vector<20x16xf32>
    %60 = vector.broadcast %8 : vector<20x1xf32> to vector<20x16xf32>
    %61 = arith.addf %59, %60 : vector<20x16xf32>
    %cst_31 = arith.constant 0.000000e+00 : f32
    %62 = vector.broadcast %cst_31 : f32 to vector<20x16xf32>
    %63 = arith.maximumf %61, %62 : vector<20x16xf32>
    %cst_32 = arith.constant dense<0.000000e+00> : vector<20x16xf32>
    %64 = tpu.matmul %4, %63, %cst_32 {dimension_numbers = #tpu.dot_dimension_numbers<[1], [0], [0], [1], [0, 0, 1, 1], [], []>} : vector<20x20xf32>, vector<20x16xf32>, vector<20x16xf32> -> vector<20x16xf32>
    %65 = vector.broadcast %9 : vector<20x1xf32> to vector<20x16xf32>
    %66 = arith.addf %64, %65 : vector<20x16xf32>
    %cst_33 = arith.constant 0.000000e+00 : f32
    %67 = vector.broadcast %cst_33 : f32 to vector<20x16xf32>
    %68 = arith.maximumf %66, %67 : vector<20x16xf32>
    %cst_34 = arith.constant dense<0.000000e+00> : vector<10x16xf32>
    %69 = tpu.matmul %5, %68, %cst_34 {dimension_numbers = #tpu.dot_dimension_numbers<[1], [0], [0], [1], [0, 0, 1, 1], [], []>} : vector<10x20xf32>, vector<20x16xf32>, vector<10x16xf32> -> vector<10x16xf32>
    %70 = vector.broadcast %10 : vector<10x1xf32> to vector<10x16xf32>
    %71 = arith.addf %69, %70 : vector<10x16xf32>
    %cst_35 = arith.constant 0.000000e+00 : f32
    %72 = vector.broadcast %cst_35 : f32 to vector<10x16xf32>
    %73 = arith.maximumf %71, %72 : vector<10x16xf32>
    %cst_36 = arith.constant dense<0.000000e+00> : vector<2x16xf32>
    %74 = tpu.matmul %6, %73, %cst_36 {dimension_numbers = #tpu.dot_dimension_numbers<[1], [0], [0], [1], [0, 0, 1, 1], [], []>} : vector<2x10xf32>, vector<10x16xf32>, vector<2x16xf32> -> vector<2x16xf32>
    %75 = vector.broadcast %11 : vector<2x1xf32> to vector<2x16xf32>
    %76 = arith.addf %74, %75 : vector<2x16xf32>
    %77 = vector.extract_strided_slice %76 {offsets = [0, 0], sizes = [1, 16], strides = [1, 1]} : vector<2x16xf32> to vector<1x16xf32>
    %78 = vector.extract_strided_slice %76 {offsets = [1, 0], sizes = [1, 16], strides = [1, 1]} : vector<2x16xf32> to vector<1x16xf32>
    %c1_37 = arith.constant 1 : index
    %c0_38 = arith.constant 0 : index
    %c0_39 = arith.constant 0 : index
    %79 = vector.load %arg6[%c1_37, %c0_38, %c0_39] : memref<4x1x16xf32, #tpu.memory_space<vmem>>, vector<1x1x16xf32>
    %80 = vector.shape_cast %79 : vector<1x1x16xf32> to vector<1x16xf32>
    %81 = vector.shape_cast %77 : vector<1x16xf32> to vector<1x1x16xf32>
    tpu.vector_store %arg6[%c1_37, %c0_38, %c0_39], %81 {strides = array<i32>} : memref<4x1x16xf32, #tpu.memory_space<vmem>>, vector<1x1x16xf32>,
    %c1_40 = arith.constant 1 : index
    %c0_41 = arith.constant 0 : index
    %c0_42 = arith.constant 0 : index
    %82 = vector.load %arg7[%c1_40, %c0_41, %c0_42] : memref<4x1x16xf32, #tpu.memory_space<vmem>>, vector<1x1x16xf32>
    %83 = vector.shape_cast %82 : vector<1x1x16xf32> to vector<1x16xf32>
    %84 = vector.shape_cast %78 : vector<1x16xf32> to vector<1x1x16xf32>
    tpu.vector_store %arg7[%c1_40, %c0_41, %c0_42], %84 {strides = array<i32>} : memref<4x1x16xf32, #tpu.memory_space<vmem>>, vector<1x1x16xf32>,
    %c1_43 = arith.constant 1 : index
    %c0_44 = arith.constant 0 : index
    %c0_45 = arith.constant 0 : index
    %85 = vector.load %arg3[%c1_43, %c0_44, %c0_45] : memref<4x1x16xf32, #tpu.memory_space<vmem>>, vector<1x1x16xf32>
    %86 = vector.shape_cast %85 : vector<1x1x16xf32> to vector<1x16xf32>
    %87 = arith.mulf %78, %86 : vector<1x16xf32>
    %88 = arith.addf %77, %87 : vector<1x16xf32>
    %c1_46 = arith.constant 1 : index
    %c0_47 = arith.constant 0 : index
    %c0_48 = arith.constant 0 : index
    %89 = vector.load %arg8[%c1_46, %c0_47, %c0_48] : memref<4x1x16xf32, #tpu.memory_space<vmem>>, vector<1x1x16xf32>
    %90 = vector.shape_cast %89 : vector<1x1x16xf32> to vector<1x16xf32>
    %91 = vector.shape_cast %88 : vector<1x16xf32> to vector<1x1x16xf32>
    tpu.vector_store %arg8[%c1_46, %c0_47, %c0_48], %91 {strides = array<i32>} : memref<4x1x16xf32, #tpu.memory_space<vmem>>, vector<1x1x16xf32>,
    %c2 = arith.constant 2 : index
    %c0_49 = arith.constant 0 : index
    %c0_50 = arith.constant 0 : index
    %92 = vector.load %arg2[%c2, %c0_49, %c0_50] : memref<4x16x16xf32, #tpu.memory_space<vmem>>, vector<1x16x16xf32>
    %93 = vector.shape_cast %92 : vector<1x16x16xf32> to vector<16x16xf32>
    %cst_51 = arith.constant dense<0.000000e+00> : vector<20x16xf32>
    %94 = tpu.matmul %2, %93, %cst_51 {dimension_numbers = #tpu.dot_dimension_numbers<[1], [0], [0], [1], [0, 0, 1, 1], [], []>} : vector<20x16xf32>, vector<16x16xf32>, vector<20x16xf32> -> vector<20x16xf32>
    %95 = vector.broadcast %7 : vector<20x1xf32> to vector<20x16xf32>
    %96 = arith.addf %94, %95 : vector<20x16xf32>
    %cst_52 = arith.constant 0.000000e+00 : f32
    %97 = vector.broadcast %cst_52 : f32 to vector<20x16xf32>
    %98 = arith.maximumf %96, %97 : vector<20x16xf32>
    %cst_53 = arith.constant dense<0.000000e+00> : vector<20x16xf32>
    %99 = tpu.matmul %3, %98, %cst_53 {dimension_numbers = #tpu.dot_dimension_numbers<[1], [0], [0], [1], [0, 0, 1, 1], [], []>} : vector<20x20xf32>, vector<20x16xf32>, vector<20x16xf32> -> vector<20x16xf32>
    %100 = vector.broadcast %8 : vector<20x1xf32> to vector<20x16xf32>
    %101 = arith.addf %99, %100 : vector<20x16xf32>
    %cst_54 = arith.constant 0.000000e+00 : f32
    %102 = vector.broadcast %cst_54 : f32 to vector<20x16xf32>
    %103 = arith.maximumf %101, %102 : vector<20x16xf32>
    %cst_55 = arith.constant dense<0.000000e+00> : vector<20x16xf32>
    %104 = tpu.matmul %4, %103, %cst_55 {dimension_numbers = #tpu.dot_dimension_numbers<[1], [0], [0], [1], [0, 0, 1, 1], [], []>} : vector<20x20xf32>, vector<20x16xf32>, vector<20x16xf32> -> vector<20x16xf32>
    %105 = vector.broadcast %9 : vector<20x1xf32> to vector<20x16xf32>
    %106 = arith.addf %104, %105 : vector<20x16xf32>
    %cst_56 = arith.constant 0.000000e+00 : f32
    %107 = vector.broadcast %cst_56 : f32 to vector<20x16xf32>
    %108 = arith.maximumf %106, %107 : vector<20x16xf32>
    %cst_57 = arith.constant dense<0.000000e+00> : vector<10x16xf32>
    %109 = tpu.matmul %5, %108, %cst_57 {dimension_numbers = #tpu.dot_dimension_numbers<[1], [0], [0], [1], [0, 0, 1, 1], [], []>} : vector<10x20xf32>, vector<20x16xf32>, vector<10x16xf32> -> vector<10x16xf32>
    %110 = vector.broadcast %10 : vector<10x1xf32> to vector<10x16xf32>
    %111 = arith.addf %109, %110 : vector<10x16xf32>
    %cst_58 = arith.constant 0.000000e+00 : f32
    %112 = vector.broadcast %cst_58 : f32 to vector<10x16xf32>
    %113 = arith.maximumf %111, %112 : vector<10x16xf32>
    %cst_59 = arith.constant dense<0.000000e+00> : vector<2x16xf32>
    %114 = tpu.matmul %6, %113, %cst_59 {dimension_numbers = #tpu.dot_dimension_numbers<[1], [0], [0], [1], [0, 0, 1, 1], [], []>} : vector<2x10xf32>, vector<10x16xf32>, vector<2x16xf32> -> vector<2x16xf32>
    %115 = vector.broadcast %11 : vector<2x1xf32> to vector<2x16xf32>
    %116 = arith.addf %114, %115 : vector<2x16xf32>
    %117 = vector.extract_strided_slice %116 {offsets = [0, 0], sizes = [1, 16], strides = [1, 1]} : vector<2x16xf32> to vector<1x16xf32>
    %118 = vector.extract_strided_slice %116 {offsets = [1, 0], sizes = [1, 16], strides = [1, 1]} : vector<2x16xf32> to vector<1x16xf32>
    %c2_60 = arith.constant 2 : index
    %c0_61 = arith.constant 0 : index
    %c0_62 = arith.constant 0 : index
    %119 = vector.load %arg6[%c2_60, %c0_61, %c0_62] : memref<4x1x16xf32, #tpu.memory_space<vmem>>, vector<1x1x16xf32>
    %120 = vector.shape_cast %119 : vector<1x1x16xf32> to vector<1x16xf32>
    %121 = vector.shape_cast %117 : vector<1x16xf32> to vector<1x1x16xf32>
    tpu.vector_store %arg6[%c2_60, %c0_61, %c0_62], %121 {strides = array<i32>} : memref<4x1x16xf32, #tpu.memory_space<vmem>>, vector<1x1x16xf32>,
    %c2_63 = arith.constant 2 : index
    %c0_64 = arith.constant 0 : index
    %c0_65 = arith.constant 0 : index
    %122 = vector.load %arg7[%c2_63, %c0_64, %c0_65] : memref<4x1x16xf32, #tpu.memory_space<vmem>>, vector<1x1x16xf32>
    %123 = vector.shape_cast %122 : vector<1x1x16xf32> to vector<1x16xf32>
    %124 = vector.shape_cast %118 : vector<1x16xf32> to vector<1x1x16xf32>
    tpu.vector_store %arg7[%c2_63, %c0_64, %c0_65], %124 {strides = array<i32>} : memref<4x1x16xf32, #tpu.memory_space<vmem>>, vector<1x1x16xf32>,
    %c2_66 = arith.constant 2 : index
    %c0_67 = arith.constant 0 : index
    %c0_68 = arith.constant 0 : index
    %125 = vector.load %arg3[%c2_66, %c0_67, %c0_68] : memref<4x1x16xf32, #tpu.memory_space<vmem>>, vector<1x1x16xf32>
    %126 = vector.shape_cast %125 : vector<1x1x16xf32> to vector<1x16xf32>
    %127 = arith.mulf %118, %126 : vector<1x16xf32>
    %128 = arith.addf %117, %127 : vector<1x16xf32>
    %c2_69 = arith.constant 2 : index
    %c0_70 = arith.constant 0 : index
    %c0_71 = arith.constant 0 : index
    %129 = vector.load %arg8[%c2_69, %c0_70, %c0_71] : memref<4x1x16xf32, #tpu.memory_space<vmem>>, vector<1x1x16xf32>
    %130 = vector.shape_cast %129 : vector<1x1x16xf32> to vector<1x16xf32>
    %131 = vector.shape_cast %128 : vector<1x16xf32> to vector<1x1x16xf32>
    tpu.vector_store %arg8[%c2_69, %c0_70, %c0_71], %131 {strides = array<i32>} : memref<4x1x16xf32, #tpu.memory_space<vmem>>, vector<1x1x16xf32>,
    %c3 = arith.constant 3 : index
    %c0_72 = arith.constant 0 : index
    %c0_73 = arith.constant 0 : index
    %132 = vector.load %arg2[%c3, %c0_72, %c0_73] : memref<4x16x16xf32, #tpu.memory_space<vmem>>, vector<1x16x16xf32>
    %133 = vector.shape_cast %132 : vector<1x16x16xf32> to vector<16x16xf32>
    %cst_74 = arith.constant dense<0.000000e+00> : vector<20x16xf32>
    %134 = tpu.matmul %2, %133, %cst_74 {dimension_numbers = #tpu.dot_dimension_numbers<[1], [0], [0], [1], [0, 0, 1, 1], [], []>} : vector<20x16xf32>, vector<16x16xf32>, vector<20x16xf32> -> vector<20x16xf32>
    %135 = vector.broadcast %7 : vector<20x1xf32> to vector<20x16xf32>
    %136 = arith.addf %134, %135 : vector<20x16xf32>
    %cst_75 = arith.constant 0.000000e+00 : f32
    %137 = vector.broadcast %cst_75 : f32 to vector<20x16xf32>
    %138 = arith.maximumf %136, %137 : vector<20x16xf32>
    %cst_76 = arith.constant dense<0.000000e+00> : vector<20x16xf32>
    %139 = tpu.matmul %3, %138, %cst_76 {dimension_numbers = #tpu.dot_dimension_numbers<[1], [0], [0], [1], [0, 0, 1, 1], [], []>} : vector<20x20xf32>, vector<20x16xf32>, vector<20x16xf32> -> vector<20x16xf32>
    %140 = vector.broadcast %8 : vector<20x1xf32> to vector<20x16xf32>
    %141 = arith.addf %139, %140 : vector<20x16xf32>
    %cst_77 = arith.constant 0.000000e+00 : f32
    %142 = vector.broadcast %cst_77 : f32 to vector<20x16xf32>
    %143 = arith.maximumf %141, %142 : vector<20x16xf32>
    %cst_78 = arith.constant dense<0.000000e+00> : vector<20x16xf32>
    %144 = tpu.matmul %4, %143, %cst_78 {dimension_numbers = #tpu.dot_dimension_numbers<[1], [0], [0], [1], [0, 0, 1, 1], [], []>} : vector<20x20xf32>, vector<20x16xf32>, vector<20x16xf32> -> vector<20x16xf32>
    %145 = vector.broadcast %9 : vector<20x1xf32> to vector<20x16xf32>
    %146 = arith.addf %144, %145 : vector<20x16xf32>
    %cst_79 = arith.constant 0.000000e+00 : f32
    %147 = vector.broadcast %cst_79 : f32 to vector<20x16xf32>
    %148 = arith.maximumf %146, %147 : vector<20x16xf32>
    %cst_80 = arith.constant dense<0.000000e+00> : vector<10x16xf32>
    %149 = tpu.matmul %5, %148, %cst_80 {dimension_numbers = #tpu.dot_dimension_numbers<[1], [0], [0], [1], [0, 0, 1, 1], [], []>} : vector<10x20xf32>, vector<20x16xf32>, vector<10x16xf32> -> vector<10x16xf32>
    %150 = vector.broadcast %10 : vector<10x1xf32> to vector<10x16xf32>
    %151 = arith.addf %149, %150 : vector<10x16xf32>
    %cst_81 = arith.constant 0.000000e+00 : f32
    %152 = vector.broadcast %cst_81 : f32 to vector<10x16xf32>
    %153 = arith.maximumf %151, %152 : vector<10x16xf32>
    %cst_82 = arith.constant dense<0.000000e+00> : vector<2x16xf32>
    %154 = tpu.matmul %6, %153, %cst_82 {dimension_numbers = #tpu.dot_dimension_numbers<[1], [0], [0], [1], [0, 0, 1, 1], [], []>} : vector<2x10xf32>, vector<10x16xf32>, vector<2x16xf32> -> vector<2x16xf32>
    %155 = vector.broadcast %11 : vector<2x1xf32> to vector<2x16xf32>
    %156 = arith.addf %154, %155 : vector<2x16xf32>
    %157 = vector.extract_strided_slice %156 {offsets = [0, 0], sizes = [1, 16], strides = [1, 1]} : vector<2x16xf32> to vector<1x16xf32>
    %158 = vector.extract_strided_slice %156 {offsets = [1, 0], sizes = [1, 16], strides = [1, 1]} : vector<2x16xf32> to vector<1x16xf32>
    %c3_83 = arith.constant 3 : index
    %c0_84 = arith.constant 0 : index
    %c0_85 = arith.constant 0 : index
    %159 = vector.load %arg6[%c3_83, %c0_84, %c0_85] : memref<4x1x16xf32, #tpu.memory_space<vmem>>, vector<1x1x16xf32>
    %160 = vector.shape_cast %159 : vector<1x1x16xf32> to vector<1x16xf32>
    %161 = vector.shape_cast %157 : vector<1x16xf32> to vector<1x1x16xf32>
    tpu.vector_store %arg6[%c3_83, %c0_84, %c0_85], %161 {strides = array<i32>} : memref<4x1x16xf32, #tpu.memory_space<vmem>>, vector<1x1x16xf32>,
    %c3_86 = arith.constant 3 : index
    %c0_87 = arith.constant 0 : index
    %c0_88 = arith.constant 0 : index
    %162 = vector.load %arg7[%c3_86, %c0_87, %c0_88] : memref<4x1x16xf32, #tpu.memory_space<vmem>>, vector<1x1x16xf32>
    %163 = vector.shape_cast %162 : vector<1x1x16xf32> to vector<1x16xf32>
    %164 = vector.shape_cast %158 : vector<1x16xf32> to vector<1x1x16xf32>
    tpu.vector_store %arg7[%c3_86, %c0_87, %c0_88], %164 {strides = array<i32>} : memref<4x1x16xf32, #tpu.memory_space<vmem>>, vector<1x1x16xf32>,
    %c3_89 = arith.constant 3 : index
    %c0_90 = arith.constant 0 : index
    %c0_91 = arith.constant 0 : index
    %165 = vector.load %arg3[%c3_89, %c0_90, %c0_91] : memref<4x1x16xf32, #tpu.memory_space<vmem>>, vector<1x1x16xf32>
    %166 = vector.shape_cast %165 : vector<1x1x16xf32> to vector<1x16xf32>
    %167 = arith.mulf %158, %166 : vector<1x16xf32>
    %168 = arith.addf %157, %167 : vector<1x16xf32>
    %c3_92 = arith.constant 3 : index
    %c0_93 = arith.constant 0 : index
    %c0_94 = arith.constant 0 : index
    %169 = vector.load %arg8[%c3_92, %c0_93, %c0_94] : memref<4x1x16xf32, #tpu.memory_space<vmem>>, vector<1x1x16xf32>
    %170 = vector.shape_cast %169 : vector<1x1x16xf32> to vector<1x16xf32>
    %171 = vector.shape_cast %168 : vector<1x16xf32> to vector<1x1x16xf32>
    tpu.vector_store %arg8[%c3_92, %c0_93, %c0_94], %171 {strides = array<i32>} : memref<4x1x16xf32, #tpu.memory_space<vmem>>, vector<1x1x16xf32>,
    return
  }
  func.func @transform_0(%arg0: i32, %arg1: i32) -> (i32, i32, i32) {
    %c0_i32 = arith.constant 0 : i32
    %c0_i32_0 = arith.constant 0 : i32
    return %arg0, %c0_i32, %arg1 : i32, i32, i32
  }
  func.func @transform_1(%arg0: i32, %arg1: i32) -> (i32, i32, i32) {
    %c0_i32 = arith.constant 0 : i32
    %c0_i32_0 = arith.constant 0 : i32
    return %arg0, %c0_i32, %arg1 : i32, i32, i32
  }
  func.func @transform_2(%arg0: i32, %arg1: i32) -> (i32, i32) {
    %c0_i32 = arith.constant 0 : i32
    %c0_i32_0 = arith.constant 0 : i32
    %c0_i32_1 = arith.constant 0 : i32
    return %c0_i32, %c0_i32_0 : i32, i32
  }
  func.func @transform_3(%arg0: i32, %arg1: i32) -> (i32, i32) {
    %c0_i32 = arith.constant 0 : i32
    %c0_i32_0 = arith.constant 0 : i32
    %c0_i32_1 = arith.constant 0 : i32
    return %c0_i32, %c0_i32_0 : i32, i32
  }
  func.func @transform_4(%arg0: i32, %arg1: i32) -> (i32, i32, i32) {
    %c0_i32 = arith.constant 0 : i32
    %c0_i32_0 = arith.constant 0 : i32
    return %arg0, %c0_i32, %arg1 : i32, i32, i32
  }
  func.func @transform_5(%arg0: i32, %arg1: i32) -> (i32, i32, i32) {
    %c0_i32 = arith.constant 0 : i32
    %c0_i32_0 = arith.constant 0 : i32
    return %arg0, %c0_i32, %arg1 : i32, i32, i32
  }
  func.func @transform_6(%arg0: i32, %arg1: i32) -> (i32, i32, i32) {
    %c0_i32 = arith.constant 0 : i32
    %c0_i32_0 = arith.constant 0 : i32
    return %arg0, %c0_i32, %arg1 : i32, i32, i32
  }
}

</mosaic_0001>

<bundles_post_ra>
// kernel: mlp_emb_kin_forward.1
= control target key start
LH: loop header
LB: loop body
LE: loop exit
PB: predicated region body
PF: predicated region fallthrough
CT: control target
= control target key end

     0   :  { %s3754_s0 = inlined_call_operand.vmem [shape: f32[8,16,16], index: 0, kind: input, shape index: {}]   ;;  %s3755_s1 = inlined_call_operand.vmem [shape: f32[8,1,16], index: 1, kind: input, shape index: {}]   ;;  %s3756_s2 = inlined_call_operand.vmem [shape: f32[96,20], index: 2, kind: input, shape index: {}]   ;;  %s3757_s3 = inlined_call_operand.vmem [shape: f32[96,1], index: 3, kind: input, shape index: {}]   ;;  %s3758_s4 = inlined_call_operand.hbm [shape: f32[8,1,16], index: 4, kind: output, shape index: {0}]   ;;  %s3759_s5 = inlined_call_operand.hbm [shape: f32[8,1,16], index: 5, kind: output, shape index: {1}]   ;;  %s3760_s6 = inlined_call_operand.hbm [shape: f32[8,1,16], index: 6, kind: output, shape index: {2}]  }
   0x1   :  { %3765 = sst [smem:[#allocation9_spill]] %s3754_s0 }
   0x2   :  { %12 = vsyncpa [#allocation3], 0 }
   0x3   :  { %14 = vsyncpa [#allocation3 + $0x1], 0 }
   0x4   :  { %15 = vsyncpa [#allocation5], 0 }
   0x5   :  { %17 = vsyncpa [#allocation5 + $0x1], 0  ;;  %s3089_s21 = smov 0   ;;  %s3091_s22 = smov 0  }
   0x6   :  { %s3093_s23 = smov 0   ;;  %s3095_s24 = smov 0  }
   0x7   :  { %s3097_s25 = smov 0   ;;  %s3099_s26 = smov 0  }
   0x8 LB: > { %s2391_s27 = sadd.s32 4294967295, %s3044_s26   ;;  %s3761_s28 = sadd.s32 4294967294, %s3044_s26   ;;  %s3044_s26 = sphi %s3099_s26, %s23_s26   ;;  %s3040_s25 = sphi %s3097_s25, %s3779_s25   ;;  %s3036_s24 = sphi %s3095_s24, %s3778_s24   ;;  %s3032_s23 = sphi %s3093_s23, %s3777_s23   ;;  %s3028_s22 = sphi %s3091_s22, %s3776_s22   ;;  %s3024_s21 = sphi %s3089_s21, %s3775_s21  }
   0x9   : > { %s35_s29 = sadd.s32 1, %s3040_s25  ;;  %s142_s30 = sadd.s32 1, %s3032_s23 }
   0xa   : > { %p37_p0 = scmp.ge.s32.totalorder %s35_s29, 2  ;;  %p152_p1 = scmp.ne.s32.totalorder %s3032_s23, %s3028_s22 }
   0xb   : > { %p153_p2 = scmp.eq.s32.totalorder %s2391_s27, 1  ;;  %p158_p3 = scmp.ne.s32.totalorder %s3028_s22, %s3024_s21 }
   0xc   : > { %s3781_s29 = smov (%p37_p0, %s35_s29), 0  ;;  %p159_p5 = scmp.eq.s32.totalorder %s3761_s28, 1 }
   0xd   : > { %p3131_p4 = por %p153_p2, %p152_p1  ;;  %s137_s8 = ssub.s32 %s3040_s25, %s3781_s29 }
   0xe   : > { %p2395_p6 = scmp.ge.s32.totalorder %s3044_s26, 1  ;;  %p140_p7 = scmp.eq.s32.totalorder %s137_s8, 0 }
   0xf   : > { %p3140_p8 = por %p159_p5, %p158_p3  ;;  %p263_p9 = scmp.lt.s32.totalorder %s3044_s26, 3 }
  0x10   : > { %s3146_s10 = scalar_select %p140_p7, %s3032_s23, %s142_s30  }
  0x11   : > { %p264_p10 = pnand %p2395_p6, %p263_p9 }
  0x12   : > { %s2399_s11 = sshll.u32 (!%p264_p10), %s3036_s24, 2  ;;  %s3768_s0 = sld [smem:[#allocation9_spill]] (!%p264_p10) }
  0x13   : > { %267 = sbr.rel (%p264_p10) target bundleno = 3626 (0xe2a), region = 36  ;;  %p315_p11 = scmp.lt.s32.totalorder (!%p264_p10), %s2399_s11, 7 }
  0x14   : > { %s3762_s13 = sand.u32 (!%p264_p10), 1, %s3028_s22  }
  0x15   : > { %s2396_s14 = sshll.u32 (!%p264_p10), %s3762_s13, 2 }
  0x16   : > { %s3382_s18 = scalar_lea.vmem (!%p264_p10), [#allocation2], %s2396_s14  ;;  %s3386_s19 = scalar_lea.vmem (!%p264_p10), [#allocation4], %s2396_s14 }
  0x17   : > { %s2219_s30 = sshll.u32 (!%p264_p10), %s3386_s19, 4  ;;  %s2202_s8 = sshll.u32 (!%p264_p10), %s3382_s18, 4  ;;  %s3623_s30 = int_to_ptr.vmem [resolvable:$true] %s2219_s30  ;;  %s3631_s8 = int_to_ptr.vmem [resolvable:$true] %s2202_s8 }
  0x18   : > { %v3046_v0 = vmov 0.0   ;;  %vm3047_vm0 = vmmov 0   ;;  %v349_v1 = vld [vmem:[%s3757_s3 + $0x10] sm:$0xff]  ;;  %v3048_v2 = vmov 0   ;;  %v347_v3 = vld [vmem:[%s3757_s3] sm:$0xff]  ;;  %s3783_s11 = smov (!%p315_p11, %s2399_s11), 7 }
  0x19   : > { %2604 = vmatprep.subr.mxu0 %v3046_v0  ;;  %2608 = vmatprep.mubr.msk.f32.mxu0 %vm3047_vm0, %v3046_v0  ;;  %v348_v4 = vld [vmem:[%s3757_s3 + $0x8] sm:$0xff]  ;;  %s2500_s20 = sshll.u32 %s3783_s11, 4  ;;  %v3180_v8 = vld [vmem:[%s3756_s2] sm:$0xff]  ;;  %vm376_vm1 = vcmask 130048   ;;  %v350_v10 = vld [vmem:[%s3757_s3 + $0x18] sm:$0xff]  ;;  %vm494_vm2 = vcmask 1043456   ;;  %s3376_s17 = scalar_lea.vmem %s3755_s1, %s3783_s11 }
  0x1a   : > { %2910 = vset.pattern.permute.xlu0 %v3048_v2  ;;  %2911 = vset.pattern.permute.xlu1 %v3048_v2  ;;  %v352_v5 = vld [vmem:[%s3757_s3 + $0x28] sm:$0xff]  ;;  %s3173_s12 = scalar_lea.vmem %s3768_s0, %s2500_s20  ;;  %v351_v9 = vld [vmem:[%s3757_s3 + $0x20] sm:$0xff]  ;;  %v354_v13 = vld [vmem:[%s3757_s3 + $0x38] sm:$0xff]  ;;  %vm484_vm3 = vcmask 162816   ;;  %vm796_vm4 = vcmask 1041408   ;;  %vm792_vm5 = vcmask 80896  }
  0x1b   : > { %373 = vperm.xlu0 %2910, %v349_v1   ;;  %363 = vperm.xlu1 %2911, %v347_v3   ;;  %v360_v6 = vld [vmem:[%s3173_s12 + $0x8] sm:$0xff]  ;;  %v359_v7 = vld [vmem:[%s3173_s12] sm:$0xff]  ;;  %v3212_v14 = vld [vmem:[%s3756_s2 + $0x10] sm:$0xff]  ;;  %vm870_vm6 = vcmask 122880   ;;  %vm872_vm7 = vcmask 123905   ;;  %s3390_s11 = scalar_lea.vmem [#allocation6], %s2396_s14 }
  0x1c   : > { %2617 = vmatprep.subr.mxu1 %v3046_v0  ;;  %2623 = vmatprep.mubr.msk.f32.mxu1 %vm3047_vm0, %v3046_v0  ;;  %v3196_v11 = vld [vmem:[%s3756_s2 + $0x8] sm:$0xff]  ;;  %v355_v12 = vld [vmem:[%s3757_s3 + $0x40] sm:$0xff]  ;;  %v353_v15 = vld [vmem:[%s3757_s3 + $0x30] sm:$0xff]  ;;  %s3609_s20 = sshll.u32 %s3036_s24, 6  ;;  %s2912_s15 = scalar_lea.vmem %s3623_s30, 64 }
  0x1d   : > { %2605 = vmatpush3.msra.mxu0 %v360_v6  ;;  %v357_v16 = vld [vmem:[%s3757_s3 + $0x50] sm:$0xff]  ;;  %v356_v17 = vld [vmem:[%s3757_s3 + $0x48] sm:$0xff]  ;;  %v358_v18 = vld [vmem:[%s3757_s3 + $0x58] sm:$0xff]  ;;  %s3621_s16 = scalar_lea.hbm %s3759_s5, %s3609_s20  ;;  %s3629_s28 = scalar_lea.hbm %s3758_s4, %s3609_s20 }
  0x1e   : > { %2606 = vmatprep.subr.mxu0 %v3046_v0  ;;  %v3244_v34 = vld [vmem:[%s3756_s2 + $0x18] sm:$0xff]  ;;  %v3254_v35 = vld [vmem:[%s3756_s2 + $0x20] sm:$0xff]  ;;  %v3263_v36 = vld [vmem:[%s3756_s2 + $0x28] sm:$0xff]  ;;  %p2913_p12 = scmp.ne.s32.totalorder %s3623_s30, %s2912_s15  ;;  %s3049_s24 = smov [#allocation4]  }
  0x1f   : > { %368 = vperm.xlu0 %2910, %v348_v4   ;;  %481 = vperm.xlu1 %2911, %v352_v5   ;;  %v3281_v52 = vld [vmem:[%s3756_s2 + $0x30] sm:$0xff]  ;;  %v3292_v53 = vld [vmem:[%s3756_s2 + $0x38] sm:$0xff]  ;;  %v3301_v54 = vld [vmem:[%s3756_s2 + $0x40] sm:$0xff] }
  0x20   : > { %2607 = vmatpush3.msra.mxu0 %v359_v7  ;;  %v3310_v55 = vld [vmem:[%s3756_s2 + $0x48] sm:$0xff]  ;;  %p2914_p13 = pnand %p2913_p12, %p3131_p4 }
  0x21   : > { %2609 = vmatmul.mubr.msk.f32.vlgmr.msra.gmra.mxu0 %vm376_vm1, %v3180_v8  ;;  %2632 = vmatprep.subr.mxu0 %v3046_v0 }
  0x22   : > { %2611 = vmatprep.mubr.msk.f32.mxu0 %vm3047_vm0, %v3046_v0  ;;  %p2915_p0 = pneg %p2914_p13 }
  0x23   : > { %476 = vperm.xlu0 %2910, %v351_v9   ;;  %471 = vperm.xlu1 %2911, %v350_v10   ;;  %v3328_v9 = vld [vmem:[%s3756_s2 + $0x50] sm:$0xff] }
  0x25   : > { %2612 = vmatmul.mubr.msk.f32.gmra.mxu0 %vm376_vm1, %v3196_v11 }
  0x26   : > { %2614 = vmatprep.mubr.msk.f32.mxu0 %vm3047_vm0, %v3046_v0 }
  0x27   : > { %593 = vperm.xlu0 %2910, %v355_v12   ;;  %588 = vperm.xlu1 %2911, %v354_v13  }
  0x29   : > { %2615 = vmatmul.mubr.msk.f32.gmra.mxu0 %vm376_vm1, %v3212_v14 }
  0x2a   : > { %2638 = vmatprep.mubr.msk.f32.mxu0 %vm3047_vm0, %v3046_v0 }
  0x2b   : > { %583 = vperm.xlu0 %2910, %v353_v15   ;;  %698 = vperm.xlu1 %2911, %v357_v16  }
  0x2f   : > { %693 = vperm.xlu0 %2910, %v356_v17   ;;  %789 = vperm.xlu1 %2911, %v358_v18  }
  0x96   : > { %v3230_v20 = vpop.permute.xlu0 %373  ;;  %v3236_v28 = vpop.permute.xlu1 %363 }
  0x9a   : > { %v3232_v24 = vpop.permute.xlu0 %368  ;;  %v3267_v39 = vpop.permute.xlu1 %481 }
  0x9e   : > { %v3269_v42 = vpop.permute.xlu0 %476  ;;  %v3273_v46 = vpop.permute.xlu1 %471 }
  0xa2   : > { %v3314_v58 = vpop.permute.xlu0 %593  ;;  %v3316_v61 = vpop.permute.xlu1 %588 }
  0xa6   : > { %v3320_v2 = vpop.permute.xlu0 %583  ;;  %v3335_v10 = vpop.permute.xlu1 %698 }
  0xaa   : > { %v3338_v15 = vpop.permute.xlu0 %693 }
  0xe1   : > { %v452_v19 = vpop.f32.mrf.mxu0 }
  0xe2   : > { %v453_v30 = vadd.f32 %v452_v19, %v3236_v28 }
  0xe3   : > { %v2610_v21 = vpop.f32.mrf.mxu0 }
  0xe4   : > { %v466_v33 = vmax.f32 %v453_v30, 0.0  ;;  %v3345_v21 = vld [vmem:[%s3756_s2 + $0x58] sm:$0xff] }
  0xe5   : > { %v457_v22 = vpop.f32.mrf.mxu0 }
  0xe6   : > { %v458_v26 = vadd.f32 %v457_v22, %v3232_v24  ;;  %v2421_v22 = vld [vmem:[%s3173_s12 + $0x18] sm:$0xff] }
  0xe7   : > { %v2613_v23 = vpop.f32.mrf.mxu0 }
  0xe8   : > { %v467_v32 = vmax.f32 %v458_v26, 0.0  ;;  %v2420_v23 = vld [vmem:[%s3173_s12 + $0x10] sm:$0xff] }
  0xe9   : > { %v462_v25 = vpop.f32.mrf.mxu0 }
  0xea   : > { %v463_v27 = vadd.f32 %v462_v25, %v3230_v20  ;;  %v3378_v25 = vpop.permute.xlu1 %789 }
  0xeb   : > { %v2616_v29 = vpop.f32.mrf.mxu0 }
  0xec   : > { %v468_v31 = vmax.f32 %v463_v27, 0.0  ;;  %v2419_v27 = vld [vmem:[%s3376_s17] ss:$0 sm:$0xff] }
  0xee   : > { %2618 = vmatpush3.msk.msra.mxu1 %vm494_vm2, %v468_v31 }
  0xef   : > { %2619 = vmatprep.subr.mxu1 %v3046_v0 }
  0xf0   : > { %2620 = vmatpush3.msra.mxu1 %v467_v32 }
  0xf1   : > { %2621 = vmatprep.subr.mxu1 %v3046_v0 }
  0xf2   : > { %2622 = vmatpush3.msra.mxu1 %v466_v33 }
  0xf3   : > { %2624 = vmatmul.mubr.msk.f32.vlgmr.msra.gmra.mxu1 %vm484_vm3, %v3244_v34 }
  0xf4   : > { %2626 = vmatprep.mubr.msk.f32.mxu1 %vm3047_vm0, %v3046_v0 }
  0xf7   : > { %2627 = vmatmul.mubr.msk.f32.gmra.mxu1 %vm484_vm3, %v3254_v35 }
  0xf8   : > { %2629 = vmatprep.mubr.msk.f32.mxu1 %vm3047_vm0, %v3046_v0 }
  0xfb   : > { %2630 = vmatmul.mubr.msk.f32.gmra.mxu1 %vm484_vm3, %v3263_v36 }
  0xfc   : > { %2653 = vmatprep.mubr.msk.f32.mxu1 %vm484_vm3, %v3310_v55 }
 0x1b3   : > { %v564_v37 = vpop.f32.mrf.mxu1 }
 0x1b4   : > { %v565_v48 = vadd.f32 %v564_v37, %v3273_v46 }
 0x1b5   : > { %v2625_v38 = vpop.f32.mrf.mxu1 }
 0x1b6   : > { %v578_v51 = vmax.f32 %v565_v48, 0.0 }
 0x1b7   : > { %v569_v40 = vpop.f32.mrf.mxu1 }
 0x1b8   : > { %v570_v44 = vadd.f32 %v569_v40, %v3269_v42 }
 0x1b9   : > { %v2628_v41 = vpop.f32.mrf.mxu1 }
 0x1ba   : > { %v579_v50 = vmax.f32 %v570_v44, 0.0 }
 0x1bb   : > { %v574_v43 = vpop.f32.mrf.mxu1 }
 0x1bc   : > { %v575_v45 = vadd.f32 %v574_v43, %v3267_v39 }
 0x1bd   : > { %v2631_v47 = vpop.f32.mrf.mxu1 }
 0x1be   : > { %v580_v49 = vmax.f32 %v575_v45, 0.0 }
 0x1c0   : > { %2633 = vmatpush3.msk.msra.mxu0 %vm494_vm2, %v580_v49 }
 0x1c1   : > { %2634 = vmatprep.subr.mxu0 %v3046_v0 }
 0x1c2   : > { %2635 = vmatpush3.msra.mxu0 %v579_v50 }
 0x1c3   : > { %2636 = vmatprep.subr.mxu0 %v3046_v0 }
 0x1c4   : > { %2637 = vmatpush3.msra.mxu0 %v578_v51 }
 0x1c5   : > { %2639 = vmatmul.mubr.msk.f32.vlgmr.msra.gmra.mxu0 %vm484_vm3, %v3281_v52  ;;  %2676 = vmatprep.subr.mxu0 %v3046_v0 }
 0x1c6   : > { %2641 = vmatprep.mubr.msk.f32.mxu0 %vm3047_vm0, %v3046_v0 }
 0x1c9   : > { %2642 = vmatmul.mubr.msk.f32.gmra.mxu0 %vm484_vm3, %v3292_v53 }
 0x1ca   : > { %2644 = vmatprep.mubr.msk.f32.mxu0 %vm3047_vm0, %v3046_v0 }
 0x1cd   : > { %2645 = vmatmul.mubr.msk.f32.gmra.mxu0 %vm484_vm3, %v3301_v54 }
 0x1ce   : > { %2682 = vmatprep.mubr.msk.f32.mxu0 %vm3047_vm0, %v3046_v0 }
 0x285   : > { %v674_v56 = vpop.f32.mrf.mxu0 }
 0x286   : > { %v675_v4 = vadd.f32 %v674_v56, %v3320_v2 }
 0x287   : > { %v2640_v57 = vpop.f32.mrf.mxu0 }
 0x288   : > { %v688_v7 = vmax.f32 %v675_v4, 0.0 }
 0x289   : > { %v679_v59 = vpop.f32.mrf.mxu0 }
 0x28a   : > { %v680_v63 = vadd.f32 %v679_v59, %v3316_v61 }
 0x28b   : > { %v2643_v60 = vpop.f32.mrf.mxu0 }
 0x28c   : > { %v689_v6 = vmax.f32 %v680_v63, 0.0 }
 0x28d   : > { %v684_v62 = vpop.f32.mrf.mxu0 }
 0x28e   : > { %v685_v1 = vadd.f32 %v684_v62, %v3314_v58 }
 0x28f   : > { %v2646_v3 = vpop.f32.mrf.mxu0 }
 0x290   : > { %v690_v5 = vmax.f32 %v685_v1, 0.0 }
 0x292   : > { %2647 = vmatprep.subr.msk.mxu1 %vm494_vm2, %v690_v5 }
 0x293   : > { %2648 = vmatpush3.msk.msra.mxu1 %vm494_vm2, %v690_v5 }
 0x294   : > { %2649 = vmatprep.subr.mxu1 %v689_v6 }
 0x295   : > { %2650 = vmatpush3.msra.mxu1 %v689_v6 }
 0x296   : > { %2651 = vmatprep.subr.mxu1 %v688_v7 }
 0x297   : > { %2652 = vmatpush3.msra.mxu1 %v688_v7 }
 0x298   : > { %2654 = vmatmul.mubr.msk.f32.vlgmr.msra.gmra.mxu1 %vm484_vm3, %v3328_v9  ;;  %2656 = vmatprep.subr.mxu1 %v3046_v0 }
 0x299   : > { %2660 = vmatprep.mubr.msk.f32.mxu1 %vm3047_vm0, %v3046_v0 }
 0x358   : > { %v2655_v12 = vpop.f32.mrf.mxu1 }
 0x359   : > { %v782_v13 = vadd.f32 %v2655_v12, %v3335_v10 }
 0x35a   : > { %v776_v16 = vpop.f32.mrf.mxu1 }
 0x35b   : > { %v786_v17 = vmax.f32 %v782_v13, 0.0  ;;  %v777_v18 = vadd.f32 %v776_v16, %v3338_v15 }
 0x35d   : > { %v785_v19 = vmax.f32 %v777_v18, 0.0  ;;  %2657 = vmatpush3.msk.msra.mxu1 %vm796_vm4, %v786_v17 }
 0x35e   : > { %2658 = vmatprep.subr.mxu1 %v3046_v0 }
 0x35f   : > { %2659 = vmatpush3.msra.mxu1 %v785_v19 }
 0x360   : > { %2661 = vmatmul.mubr.msk.f32.vlgmr.msra.gmra.mxu1 %vm792_vm5, %v3345_v21  ;;  %2663 = vmatprep.subr.mxu1 %v3046_v0 }
 0x361   : > { %2664 = vmatpush3.msra.mxu1 %v2421_v22  ;;  %2667 = vmatprep.mubr.msk.f32.mxu1 %vm3047_vm0, %v3046_v0 }
 0x362   : > { %2665 = vmatprep.subr.mxu1 %v3046_v0 }
 0x363   : > { %2666 = vmatpush3.msra.mxu1 %v2420_v23 }
 0x364   : > { %2668 = vmatmul.mubr.msk.f32.vlgmr.msra.gmra.mxu1 %vm376_vm1, %v3180_v8  ;;  %2691 = vmatprep.subr.mxu1 %v3046_v0 }
 0x365   : > { %2670 = vmatprep.mubr.msk.f32.mxu1 %vm3047_vm0, %v3046_v0 }
 0x368   : > { %2671 = vmatmul.mubr.msk.f32.gmra.mxu1 %vm376_vm1, %v3196_v11 }
 0x369   : > { %2673 = vmatprep.mubr.msk.f32.mxu1 %vm3047_vm0, %v3046_v0 }
 0x36c   : > { %2674 = vmatmul.mubr.msk.f32.gmra.mxu1 %vm376_vm1, %v3212_v14 }
 0x36d   : > { %2697 = vmatprep.mubr.msk.f32.mxu1 %vm3047_vm0, %v3046_v0 }
 0x420   : > { %v866_v26 = vpop.f32.mrf.mxu1 }
 0x421   : > { %v867_v29 = vadd.f32 %v866_v26, %v3378_v25 }
 0x422   : > { %v2662_v30 = vpop.f32.mrf.mxu1 }
 0x423   : > { %871 = vst.msk [vmem:[%s3382_s18] sm:$0x1] %vm870_vm6, %v867_v29  ;;  %v881_v31 = vmul.f32 %v2419_v27, %v867_v29 }
 0x424   : > { %873 = vst.msk [vmem:[%s3386_s19 - $0x1] sm:$0x2] %vm872_vm7, %v867_v29  ;;  %v956_v32 = vpop.f32.mrf.mxu1 }
 0x425   : > { %v883_v33 = vrot.slane %v881_v31, 1  ;;  %v957_v48 = vadd.f32 %v956_v32, %v3236_v28 }
 0x426   : > { %v2669_v37 = vpop.f32.mrf.mxu1 }
 0x427   : > { %v885_v38 = vadd.f32 %v883_v33, %v867_v29  ;;  %v970_v51 = vmax.f32 %v957_v48, 0.0 }
 0x428   : > { %v961_v40 = vpop.f32.mrf.mxu1 }
 0x429   : > { %886 = vst.msk [vmem:[%s3390_s11] sm:$0x1] %vm870_vm6, %v885_v38  ;;  %v962_v44 = vadd.f32 %v961_v40, %v3232_v24 }
 0x42a   : > { %v2672_v41 = vpop.f32.mrf.mxu1 }
 0x42b   : > { %v971_v50 = vmax.f32 %v962_v44, 0.0  ;;  %v2444_v41 = vld [vmem:[%s3173_s12 + $0x28] sm:$0xff] }
 0x42c   : > { %v966_v43 = vpop.f32.mrf.mxu1 }
 0x42d   : > { %v967_v45 = vadd.f32 %v966_v43, %v3230_v20  ;;  %v2443_v43 = vld [vmem:[%s3173_s12 + $0x20] sm:$0xff] }
 0x42e   : > { %v2675_v47 = vpop.f32.mrf.mxu1 }
 0x42f   : > { %v972_v49 = vmax.f32 %v967_v45, 0.0  ;;  %v2441_v45 = vld [vmem:[%s3376_s17 + $0x1] ss:$0 sm:$0xff] }
 0x431   : > { %2677 = vmatpush3.msk.msra.mxu0 %vm494_vm2, %v972_v49 }
 0x432   : > { %2678 = vmatprep.subr.mxu0 %v3046_v0 }
 0x433   : > { %2679 = vmatpush3.msra.mxu0 %v971_v50 }
 0x434   : > { %2680 = vmatprep.subr.mxu0 %v3046_v0 }
 0x435   : > { %2681 = vmatpush3.msra.mxu0 %v970_v51 }
 0x436   : > { %2683 = vmatmul.mubr.msk.f32.vlgmr.msra.gmra.mxu0 %vm484_vm3, %v3244_v34 }
 0x437   : > { %2685 = vmatprep.mubr.msk.f32.mxu0 %vm3047_vm0, %v3046_v0 }
 0x43a   : > { %2686 = vmatmul.mubr.msk.f32.gmra.mxu0 %vm484_vm3, %v3254_v35 }
 0x43b   : > { %2688 = vmatprep.mubr.msk.f32.mxu0 %vm3047_vm0, %v3046_v0 }
 0x43e   : > { %2689 = vmatmul.mubr.msk.f32.gmra.mxu0 %vm484_vm3, %v3263_v36 }
 0x43f   : > { %2712 = vmatprep.mubr.msk.f32.mxu0 %vm484_vm3, %v3310_v55 }
 0x4f6   : > { %v1042_v56 = vpop.f32.mrf.mxu0 }
 0x4f7   : > { %v1043_v4 = vadd.f32 %v1042_v56, %v3273_v46 }
 0x4f8   : > { %v2684_v57 = vpop.f32.mrf.mxu0 }
 0x4f9   : > { %v1056_v7 = vmax.f32 %v1043_v4, 0.0 }
 0x4fa   : > { %v1047_v59 = vpop.f32.mrf.mxu0 }
 0x4fb   : > { %v1048_v63 = vadd.f32 %v1047_v59, %v3269_v42 }
 0x4fc   : > { %v2687_v60 = vpop.f32.mrf.mxu0 }
 0x4fd   : > { %v1057_v6 = vmax.f32 %v1048_v63, 0.0 }
 0x4fe   : > { %v1052_v62 = vpop.f32.mrf.mxu0 }
 0x4ff   : > { %v1053_v1 = vadd.f32 %v1052_v62, %v3267_v39 }
 0x500   : > { %v2690_v3 = vpop.f32.mrf.mxu0 }
 0x501   : > { %v1058_v5 = vmax.f32 %v1053_v1, 0.0 }
 0x503   : > { %2692 = vmatpush3.msk.msra.mxu1 %vm494_vm2, %v1058_v5 }
 0x504   : > { %2693 = vmatprep.subr.mxu1 %v3046_v0 }
 0x505   : > { %2694 = vmatpush3.msra.mxu1 %v1057_v6 }
 0x506   : > { %2695 = vmatprep.subr.mxu1 %v3046_v0 }
 0x507   : > { %2696 = vmatpush3.msra.mxu1 %v1056_v7 }
 0x508   : > { %2698 = vmatmul.mubr.msk.f32.vlgmr.msra.gmra.mxu1 %vm484_vm3, %v3281_v52  ;;  %2735 = vmatprep.subr.mxu1 %v3046_v0 }
 0x509   : > { %2700 = vmatprep.mubr.msk.f32.mxu1 %vm3047_vm0, %v3046_v0 }
 0x50c   : > { %2701 = vmatmul.mubr.msk.f32.gmra.mxu1 %vm484_vm3, %v3292_v53 }
 0x50d   : > { %2703 = vmatprep.mubr.msk.f32.mxu1 %vm3047_vm0, %v3046_v0 }
 0x510   : > { %2704 = vmatmul.mubr.msk.f32.gmra.mxu1 %vm484_vm3, %v3301_v54 }
 0x511   : > { %2741 = vmatprep.mubr.msk.f32.mxu1 %vm3047_vm0, %v3046_v0 }
 0x5c8   : > { %v1128_v12 = vpop.f32.mrf.mxu1 }
 0x5c9   : > { %v1129_v26 = vadd.f32 %v1128_v12, %v3320_v2 }
 0x5ca   : > { %v2699_v13 = vpop.f32.mrf.mxu1 }
 0x5cb   : > { %v1142_v30 = vmax.f32 %v1129_v26, 0.0 }
 0x5cc   : > { %v1133_v16 = vpop.f32.mrf.mxu1 }
 0x5cd   : > { %v1134_v19 = vadd.f32 %v1133_v16, %v3316_v61 }
 0x5ce   : > { %v2702_v17 = vpop.f32.mrf.mxu1 }
 0x5cf   : > { %v1143_v29 = vmax.f32 %v1134_v19, 0.0 }
 0x5d0   : > { %v1138_v18 = vpop.f32.mrf.mxu1 }
 0x5d1   : > { %v1139_v22 = vadd.f32 %v1138_v18, %v3314_v58 }
 0x5d2   : > { %v2705_v23 = vpop.f32.mrf.mxu1 }
 0x5d3   : > { %v1144_v27 = vmax.f32 %v1139_v22, 0.0 }
 0x5d5   : > { %2706 = vmatprep.subr.msk.mxu0 %vm494_vm2, %v1144_v27 }
 0x5d6   : > { %2707 = vmatpush3.msk.msra.mxu0 %vm494_vm2, %v1144_v27 }
 0x5d7   : > { %2708 = vmatprep.subr.mxu0 %v1143_v29 }
 0x5d8   : > { %2709 = vmatpush3.msra.mxu0 %v1143_v29 }
 0x5d9   : > { %2710 = vmatprep.subr.mxu0 %v1142_v30 }
 0x5da   : > { %2711 = vmatpush3.msra.mxu0 %v1142_v30 }
 0x5db   : > { %2713 = vmatmul.mubr.msk.f32.vlgmr.msra.gmra.mxu0 %vm484_vm3, %v3328_v9  ;;  %2715 = vmatprep.subr.mxu0 %v3046_v0 }
 0x5dc   : > { %2719 = vmatprep.mubr.msk.f32.mxu0 %vm3047_vm0, %v3046_v0 }
 0x69b   : > { %v2714_v31 = vpop.f32.mrf.mxu0 }
 0x69c   : > { %v1220_v32 = vadd.f32 %v2714_v31, %v3335_v10 }
 0x69d   : > { %v1214_v33 = vpop.f32.mrf.mxu0 }
 0x69e   : > { %v1224_v37 = vmax.f32 %v1220_v32, 0.0  ;;  %v1215_v38 = vadd.f32 %v1214_v33, %v3338_v15 }
 0x6a0   : > { %v1223_v40 = vmax.f32 %v1215_v38, 0.0  ;;  %2716 = vmatpush3.msk.msra.mxu0 %vm796_vm4, %v1224_v37 }
 0x6a1   : > { %2717 = vmatprep.subr.mxu0 %v3046_v0 }
 0x6a2   : > { %2718 = vmatpush3.msra.mxu0 %v1223_v40 }
 0x6a3   : > { %2720 = vmatmul.mubr.msk.f32.vlgmr.msra.gmra.mxu0 %vm792_vm5, %v3345_v21  ;;  %2722 = vmatprep.subr.mxu0 %v3046_v0 }
 0x6a4   : > { %2723 = vmatpush3.msra.mxu0 %v2444_v41  ;;  %2726 = vmatprep.mubr.msk.f32.mxu0 %vm3047_vm0, %v3046_v0 }
 0x6a5   : > { %2724 = vmatprep.subr.mxu0 %v3046_v0 }
 0x6a6   : > { %2725 = vmatpush3.msra.mxu0 %v2443_v43 }
 0x6a7   : > { %2727 = vmatmul.mubr.msk.f32.vlgmr.msra.gmra.mxu0 %vm376_vm1, %v3180_v8  ;;  %2750 = vmatprep.subr.mxu0 %v3046_v0 }
 0x6a8   : > { %2729 = vmatprep.mubr.msk.f32.mxu0 %vm3047_vm0, %v3046_v0 }
 0x6ab   : > { %2730 = vmatmul.mubr.msk.f32.gmra.mxu0 %vm376_vm1, %v3196_v11 }
 0x6ac   : > { %2732 = vmatprep.mubr.msk.f32.mxu0 %vm3047_vm0, %v3046_v0 }
 0x6af   : > { %2733 = vmatmul.mubr.msk.f32.gmra.mxu0 %vm376_vm1, %v3212_v14 }
 0x6b0   : > { %2756 = vmatprep.mubr.msk.f32.mxu0 %vm3047_vm0, %v3046_v0 }
 0x763   : > { %v1294_v44 = vpop.f32.mrf.mxu0 }
 0x764   : > { %v1295_v47 = vadd.f32 %v1294_v44, %v3378_v25 }
 0x765   : > { %v2721_v48 = vpop.f32.mrf.mxu0 }
 0x766   : > { %2438 = vst.msk [vmem:[%s3382_s18 + $0x1] sm:$0x1] %vm870_vm6, %v1295_v47  ;;  %v1310_v49 = vmul.f32 %v2441_v45, %v1295_v47 }
 0x767   : > { %2439 = vst.msk [vmem:[%s3386_s19] sm:$0x2] %vm872_vm7, %v1295_v47  ;;  %v1386_v50 = vpop.f32.mrf.mxu0 }
 0x768   : > { %v1312_v51 = vrot.slane %v1310_v49, 1  ;;  %v1387_v4 = vadd.f32 %v1386_v50, %v3236_v28 }
 0x769   : > { %v2728_v56 = vpop.f32.mrf.mxu0 }
 0x76a   : > { %v1314_v57 = vadd.f32 %v1312_v51, %v1295_v47  ;;  %v1400_v7 = vmax.f32 %v1387_v4, 0.0 }
 0x76b   : > { %v1391_v59 = vpop.f32.mrf.mxu0 }
 0x76c   : > { %2442 = vst.msk [vmem:[%s3390_s11 + $0x1] sm:$0x1] %vm870_vm6, %v1314_v57  ;;  %v1392_v63 = vadd.f32 %v1391_v59, %v3232_v24 }
 0x76d   : > { %v2731_v60 = vpop.f32.mrf.mxu0 }
 0x76e   : > { %v1401_v6 = vmax.f32 %v1392_v63, 0.0  ;;  %v2467_v60 = vld [vmem:[%s3173_s12 + $0x38] sm:$0xff] }
 0x76f   : > { %v1396_v62 = vpop.f32.mrf.mxu0 }
 0x770   : > { %v1397_v1 = vadd.f32 %v1396_v62, %v3230_v20  ;;  %v2466_v62 = vld [vmem:[%s3173_s12 + $0x30] sm:$0xff]  ;;  %s3606_s12 = sand.u32 1, %s2391_s27   ;;  %s2916_s27 = sshll.u32 %s3049_s24, 4  ;;  %s2917_s27 = int_to_ptr.vmem [resolvable:$false] %s2916_s27 }
 0x771   : > { %v2734_v3 = vpop.f32.mrf.mxu0  ;;  %s2918_s13 = scalar_lea.vmem %s2917_s27, 128  ;;  %p2919_p1 = scmp.lt.s32.totalorder %s3623_s30, %s2917_s27 }
 0x772   : > { %v1402_v5 = vmax.f32 %v1397_v1, 0.0  ;;  %p2920_p2 = scmp.lt.s32.totalorder %s2918_s13, %s2912_s15 }
 0x774   : > { %2736 = vmatpush3.msk.msra.mxu1 %vm494_vm2, %v1402_v5  ;;  %p2921_p3 = por %p2920_p2, %p2919_p1 }
 0x775   : > { %2737 = vmatprep.subr.mxu1 %v3046_v0 }
 0x776   : > { %2738 = vmatpush3.msra.mxu1 %v1401_v6  ;;  %p2922_p5 = pnand %p2921_p3, %p2915_p0 }
 0x777   : > { %2739 = vmatprep.subr.mxu1 %v3046_v0 }
 0x778   : > { %2740 = vmatpush3.msra.mxu1 %v1400_v7 }
 0x779   : > { %2742 = vmatmul.mubr.msk.f32.vlgmr.msra.gmra.mxu1 %vm484_vm3, %v3244_v34 }
 0x77a   : > { %2744 = vmatprep.mubr.msk.f32.mxu1 %vm3047_vm0, %v3046_v0 }
 0x77d   : > { %2745 = vmatmul.mubr.msk.f32.gmra.mxu1 %vm484_vm3, %v3254_v35 }
 0x77e   : > { %2747 = vmatprep.mubr.msk.f32.mxu1 %vm3047_vm0, %v3046_v0 }
 0x781   : > { %2748 = vmatmul.mubr.msk.f32.gmra.mxu1 %vm484_vm3, %v3263_v36 }
 0x782   : > { %2771 = vmatprep.mubr.msk.f32.mxu1 %vm484_vm3, %v3310_v55 }
 0x839   : > { %v1472_v12 = vpop.f32.mrf.mxu1 }
 0x83a   : > { %v1473_v26 = vadd.f32 %v1472_v12, %v3273_v46 }
 0x83b   : > { %v2743_v13 = vpop.f32.mrf.mxu1 }
 0x83c   : > { %v1486_v30 = vmax.f32 %v1473_v26, 0.0 }
 0x83d   : > { %v1477_v16 = vpop.f32.mrf.mxu1 }
 0x83e   : > { %v1478_v19 = vadd.f32 %v1477_v16, %v3269_v42 }
 0x83f   : > { %v2746_v17 = vpop.f32.mrf.mxu1 }
 0x840   : > { %v1487_v29 = vmax.f32 %v1478_v19, 0.0 }
 0x841   : > { %v1482_v18 = vpop.f32.mrf.mxu1 }
 0x842   : > { %v1483_v22 = vadd.f32 %v1482_v18, %v3267_v39 }
 0x843   : > { %v2749_v23 = vpop.f32.mrf.mxu1 }
 0x844   : > { %v1488_v27 = vmax.f32 %v1483_v22, 0.0 }
 0x846   : > { %2751 = vmatpush3.msk.msra.mxu0 %vm494_vm2, %v1488_v27 }
 0x847   : > { %2752 = vmatprep.subr.mxu0 %v3046_v0 }
 0x848   : > { %2753 = vmatpush3.msra.mxu0 %v1487_v29 }
 0x849   : > { %2754 = vmatprep.subr.mxu0 %v3046_v0 }
 0x84a   : > { %2755 = vmatpush3.msra.mxu0 %v1486_v30 }
 0x84b   : > { %2757 = vmatmul.mubr.msk.f32.vlgmr.msra.gmra.mxu0 %vm484_vm3, %v3281_v52  ;;  %2794 = vmatprep.subr.mxu0 %v3046_v0 }
 0x84c   : > { %2759 = vmatprep.mubr.msk.f32.mxu0 %vm3047_vm0, %v3046_v0 }
 0x84f   : > { %2760 = vmatmul.mubr.msk.f32.gmra.mxu0 %vm484_vm3, %v3292_v53 }
 0x850   : > { %2762 = vmatprep.mubr.msk.f32.mxu0 %vm3047_vm0, %v3046_v0 }
 0x853   : > { %2763 = vmatmul.mubr.msk.f32.gmra.mxu0 %vm484_vm3, %v3301_v54 }
 0x854   : > { %2800 = vmatprep.mubr.msk.f32.mxu0 %vm3047_vm0, %v3046_v0 }
 0x90b   : > { %v1558_v31 = vpop.f32.mrf.mxu0 }
 0x90c   : > { %v1559_v44 = vadd.f32 %v1558_v31, %v3320_v2 }
 0x90d   : > { %v2758_v32 = vpop.f32.mrf.mxu0 }
 0x90e   : > { %v1572_v48 = vmax.f32 %v1559_v44, 0.0 }
 0x90f   : > { %v1563_v33 = vpop.f32.mrf.mxu0 }
 0x910   : > { %v1564_v40 = vadd.f32 %v1563_v33, %v3316_v61 }
 0x911   : > { %v2761_v37 = vpop.f32.mrf.mxu0 }
 0x912   : > { %v1573_v47 = vmax.f32 %v1564_v40, 0.0 }
 0x913   : > { %v1568_v38 = vpop.f32.mrf.mxu0 }
 0x914   : > { %v1569_v41 = vadd.f32 %v1568_v38, %v3314_v58 }
 0x915   : > { %v2764_v43 = vpop.f32.mrf.mxu0 }
 0x916   : > { %v1574_v45 = vmax.f32 %v1569_v41, 0.0 }
 0x918   : > { %2765 = vmatprep.subr.msk.mxu1 %vm494_vm2, %v1574_v45 }
 0x919   : > { %2766 = vmatpush3.msk.msra.mxu1 %vm494_vm2, %v1574_v45 }
 0x91a   : > { %2767 = vmatprep.subr.mxu1 %v1573_v47 }
 0x91b   : > { %2768 = vmatpush3.msra.mxu1 %v1573_v47 }
 0x91c   : > { %2769 = vmatprep.subr.mxu1 %v1572_v48 }
 0x91d   : > { %2770 = vmatpush3.msra.mxu1 %v1572_v48 }
 0x91e   : > { %2772 = vmatmul.mubr.msk.f32.vlgmr.msra.gmra.mxu1 %vm484_vm3, %v3328_v9  ;;  %2774 = vmatprep.subr.mxu1 %v3046_v0 }
 0x91f   : > { %2778 = vmatprep.mubr.msk.f32.mxu1 %vm3047_vm0, %v3046_v0 }
 0x9de   : > { %v2773_v49 = vpop.f32.mrf.mxu1 }
 0x9df   : > { %v1650_v50 = vadd.f32 %v2773_v49, %v3335_v10 }
 0x9e0   : > { %v1644_v51 = vpop.f32.mrf.mxu1 }
 0x9e1   : > { %v1654_v56 = vmax.f32 %v1650_v50, 0.0  ;;  %v1645_v57 = vadd.f32 %v1644_v51, %v3338_v15 }
 0x9e3   : > { %v1653_v59 = vmax.f32 %v1645_v57, 0.0  ;;  %2775 = vmatpush3.msk.msra.mxu1 %vm796_vm4, %v1654_v56 }
 0x9e4   : > { %2776 = vmatprep.subr.mxu1 %v3046_v0 }
 0x9e5   : > { %2777 = vmatpush3.msra.mxu1 %v1653_v59 }
 0x9e6   : > { %2779 = vmatmul.mubr.msk.f32.vlgmr.msra.gmra.mxu1 %vm792_vm5, %v3345_v21  ;;  %2781 = vmatprep.subr.mxu1 %v3046_v0 }
 0x9e7   : > { %2782 = vmatpush3.msra.mxu1 %v2467_v60  ;;  %2785 = vmatprep.mubr.msk.f32.mxu1 %vm3047_vm0, %v3046_v0 }
 0x9e8   : > { %2783 = vmatprep.subr.mxu1 %v3046_v0 }
 0x9e9   : > { %2784 = vmatpush3.msra.mxu1 %v2466_v62 }
 0x9ea   : > { %2786 = vmatmul.mubr.msk.f32.vlgmr.msra.gmra.mxu1 %vm376_vm1, %v3180_v8  ;;  %2809 = vmatprep.subr.mxu1 %v3046_v0  ;;  %v2464_v8 = vld [vmem:[%s3376_s17 + $0x2] ss:$0 sm:$0xff] }
 0x9eb   : > { %2788 = vmatprep.mubr.msk.f32.mxu1 %vm3047_vm0, %v3046_v0 }
 0x9ee   : > { %2789 = vmatmul.mubr.msk.f32.gmra.mxu1 %vm376_vm1, %v3196_v11 }
 0x9ef   : > { %2791 = vmatprep.mubr.msk.f32.mxu1 %vm3047_vm0, %v3046_v0 }
 0x9f2   : > { %2792 = vmatmul.mubr.msk.f32.gmra.mxu1 %vm376_vm1, %v3212_v14 }
 0x9f3   : > { %2815 = vmatprep.mubr.msk.f32.mxu1 %vm3047_vm0, %v3046_v0 }
 0xaa6   : > { %v1724_v63 = vpop.f32.mrf.mxu1 }
 0xaa7   : > { %v1725_v1 = vadd.f32 %v1724_v63, %v3378_v25 }
 0xaa8   : > { %v2780_v3 = vpop.f32.mrf.mxu1 }
 0xaa9   : > { %2461 = vst.msk [vmem:[%s3382_s18 + $0x2] sm:$0x1] %vm870_vm6, %v1725_v1  ;;  %v1740_v11 = vmul.f32 %v2464_v8, %v1725_v1 }
 0xaaa   : > { %2462 = vst.msk [vmem:[%s3386_s19 + $0x1] sm:$0x2] %vm872_vm7, %v1725_v1  ;;  %v1816_v4 = vpop.f32.mrf.mxu1 }
 0xaab   : > { %v1742_v5 = vrot.slane %v1740_v11, 1  ;;  %v1817_v19 = vadd.f32 %v1816_v4, %v3236_v28 }
 0xaac   : > { %v2787_v6 = vpop.f32.mrf.mxu1 }
 0xaad   : > { %v1744_v7 = vadd.f32 %v1742_v5, %v1725_v1  ;;  %v1830_v26 = vmax.f32 %v1817_v19, 0.0 }
 0xaae   : > { %v1821_v12 = vpop.f32.mrf.mxu1 }
 0xaaf   : > { %2465 = vst.msk [vmem:[%s3390_s11 + $0x2] sm:$0x1] %vm870_vm6, %v1744_v7  ;;  %v1822_v16 = vadd.f32 %v1821_v12, %v3232_v24 }
 0xab0   : > { %v2790_v14 = vpop.f32.mrf.mxu1 }
 0xab1   : > { %v1831_v23 = vmax.f32 %v1822_v16, 0.0 }
 0xab2   : > { %v1826_v13 = vpop.f32.mrf.mxu1 }
 0xab3   : > { %v1827_v17 = vadd.f32 %v1826_v13, %v3230_v20 }
 0xab4   : > { %v2793_v18 = vpop.f32.mrf.mxu1 }
 0xab5   : > { %v1832_v22 = vmax.f32 %v1827_v17, 0.0 }
 0xab7   : > { %2795 = vmatpush3.msk.msra.mxu0 %vm494_vm2, %v1832_v22 }
 0xab8   : > { %2796 = vmatprep.subr.mxu0 %v3046_v0 }
 0xab9   : > { %2797 = vmatpush3.msra.mxu0 %v1831_v23 }
 0xaba   : > { %2798 = vmatprep.subr.mxu0 %v3046_v0 }
 0xabb   : > { %2799 = vmatpush3.msra.mxu0 %v1830_v26 }
 0xabc   : > { %2801 = vmatmul.mubr.msk.f32.vlgmr.msra.gmra.mxu0 %vm484_vm3, %v3244_v34 }
 0xabd   : > { %2803 = vmatprep.mubr.msk.f32.mxu0 %vm3047_vm0, %v3046_v0 }
 0xac0   : > { %2804 = vmatmul.mubr.msk.f32.gmra.mxu0 %vm484_vm3, %v3254_v35 }
 0xac1   : > { %2806 = vmatprep.mubr.msk.f32.mxu0 %vm3047_vm0, %v3046_v0 }
 0xac4   : > { %2807 = vmatmul.mubr.msk.f32.gmra.mxu0 %vm484_vm3, %v3263_v36 }
 0xac5   : > { %2830 = vmatprep.mubr.msk.f32.mxu0 %vm484_vm3, %v3310_v55 }
 0xb7c   : > { %v1902_v20 = vpop.f32.mrf.mxu0 }
 0xb7d   : > { %v1903_v35 = vadd.f32 %v1902_v20, %v3273_v46 }
 0xb7e   : > { %v2802_v24 = vpop.f32.mrf.mxu0 }
 0xb7f   : > { %v1916_v36 = vmax.f32 %v1903_v35, 0.0 }
 0xb80   : > { %v1907_v28 = vpop.f32.mrf.mxu0 }
 0xb81   : > { %v1908_v29 = vadd.f32 %v1907_v28, %v3269_v42 }
 0xb82   : > { %v2805_v27 = vpop.f32.mrf.mxu0 }
 0xb83   : > { %v1917_v33 = vmax.f32 %v1908_v29, 0.0 }
 0xb84   : > { %v1912_v34 = vpop.f32.mrf.mxu0 }
 0xb85   : > { %v1913_v30 = vadd.f32 %v1912_v34, %v3267_v39 }
 0xb86   : > { %v2808_v31 = vpop.f32.mrf.mxu0 }
 0xb87   : > { %v1918_v32 = vmax.f32 %v1913_v30, 0.0 }
 0xb89   : > { %2810 = vmatpush3.msk.msra.mxu1 %vm494_vm2, %v1918_v32 }
 0xb8a   : > { %2811 = vmatprep.subr.mxu1 %v3046_v0 }
 0xb8b   : > { %2812 = vmatpush3.msra.mxu1 %v1917_v33 }
 0xb8c   : > { %2813 = vmatprep.subr.mxu1 %v3046_v0 }
 0xb8d   : > { %2814 = vmatpush3.msra.mxu1 %v1916_v36 }
 0xb8e   : > { %2816 = vmatmul.mubr.msk.f32.vlgmr.msra.gmra.mxu1 %vm484_vm3, %v3281_v52 }
 0xb8f   : > { %2818 = vmatprep.mubr.msk.f32.mxu1 %vm3047_vm0, %v3046_v0 }
 0xb92   : > { %2819 = vmatmul.mubr.msk.f32.gmra.mxu1 %vm484_vm3, %v3292_v53 }
 0xb93   : > { %2821 = vmatprep.mubr.msk.f32.mxu1 %vm3047_vm0, %v3046_v0 }
 0xb96   : > { %2822 = vmatmul.mubr.msk.f32.gmra.mxu1 %vm484_vm3, %v3301_v54 }
 0xc4e   : > { %v1988_v39 = vpop.f32.mrf.mxu1 }
 0xc4f   : > { %v1989_v41 = vadd.f32 %v1988_v39, %v3320_v2 }
 0xc50   : > { %v2817_v42 = vpop.f32.mrf.mxu1 }
 0xc51   : > { %v2002_v44 = vmax.f32 %v1989_v41, 0.0 }
 0xc52   : > { %v1993_v46 = vpop.f32.mrf.mxu1 }
 0xc53   : > { %v1994_v38 = vadd.f32 %v1993_v46, %v3316_v61 }
 0xc54   : > { %v2820_v55 = vpop.f32.mrf.mxu1 }
 0xc55   : > { %v2003_v53 = vmax.f32 %v1994_v38, 0.0 }
 0xc56   : > { %v1998_v37 = vpop.f32.mrf.mxu1 }
 0xc57   : > { %v1999_v52 = vadd.f32 %v1998_v37, %v3314_v58 }
 0xc58   : > { %v2823_v40 = vpop.f32.mrf.mxu1 }
 0xc59   : > { %v2004_v43 = vmax.f32 %v1999_v52, 0.0 }
 0xc5b   : > { %2824 = vmatprep.subr.msk.mxu0 %vm494_vm2, %v2004_v43 }
 0xc5c   : > { %2825 = vmatpush3.msk.msra.mxu0 %vm494_vm2, %v2004_v43 }
 0xc5d   : > { %2826 = vmatprep.subr.mxu0 %v2003_v53 }
 0xc5e   : > { %2827 = vmatpush3.msra.mxu0 %v2003_v53 }
 0xc5f   : > { %2828 = vmatprep.subr.mxu0 %v2002_v44 }
 0xc60   : > { %2829 = vmatpush3.msra.mxu0 %v2002_v44 }
 0xc61   : > { %2831 = vmatmul.mubr.msk.f32.vlgmr.msra.gmra.mxu0 %vm484_vm3, %v3328_v9  ;;  %2833 = vmatprep.subr.mxu0 %v3046_v0 }
 0xc62   : > { %2837 = vmatprep.mubr.msk.f32.mxu0 %vm3047_vm0, %v3046_v0 }
 0xd21   : > { %v2832_v54 = vpop.f32.mrf.mxu0 }
 0xd22   : > { %v2080_v58 = vadd.f32 %v2832_v54, %v3335_v10  ;;  %v2487_v10 = vld [vmem:[%s3376_s17 + $0x3] ss:$0 sm:$0xff] }
 0xd23   : > { %v2074_v61 = vpop.f32.mrf.mxu0 }
 0xd24   : > { %v2084_v2 = vmax.f32 %v2080_v58, 0.0  ;;  %v2075_v45 = vadd.f32 %v2074_v61, %v3338_v15 }
 0xd26   : > { %v2083_v47 = vmax.f32 %v2075_v45, 0.0  ;;  %2834 = vmatpush3.msk.msra.mxu0 %vm796_vm4, %v2084_v2 }
 0xd27   : > { %2835 = vmatprep.subr.mxu0 %v3046_v0 }
 0xd28   : > { %2836 = vmatpush3.msra.mxu0 %v2083_v47 }
 0xd29   : > { %2838 = vmatmul.mubr.msk.f32.vlgmr.msra.gmra.mxu0 %vm792_vm5, %v3345_v21 }
 0xde9   : > { %v2154_v9 = vpop.f32.mrf.mxu0 }
 0xdea   : > { %v3615_v0 = vadd.f32 %v2154_v9, %v3378_v25 }
 0xdeb   : > { %v2839_v15 = vpop.f32.mrf.mxu0 }
 0xdec   : > { %2484 = vst.msk [vmem:[%s3382_s18 + $0x3] sm:$0x1] %vm870_vm6, %v3615_v0  ;;  %v2170_v21 = vmul.f32 %v2487_v10, %v3615_v0 }
 0xded   : > { %2485 = vst.msk [vmem:[%s3386_s19 + $0x2] sm:$0x2] %vm872_vm7, %v3615_v0 }
 0xdee   : > { %2925 = shalt.err (!%p2922_p5)
}
 0xdef   : > { %s2926_s18 = scalar_lea.hbm %s3621_s16, 64  ;;  %s2930_s24 = scalar_lea.hbm %s3759_s5, 128 }
 0xdf0   : > { %p2927_p6 = scmp.ne.s32.totalorder %s3621_s16, %s2926_s18  ;;  %p2931_p10 = scmp.lt.s32.totalorder %s3621_s16, %s3759_s5 }
 0xdf1   : > { %p2932_p11 = scmp.lt.s32.totalorder %s2930_s24, %s2926_s18 }
 0xdf2   : > { %p2928_p7 = pnand %p2927_p6, %p3131_p4 }
 0xdf3   : > { %p2933_p12 = por %p2932_p11, %p2931_p10 }
 0xdf4   : > { %p2929_p9 = pneg %p2928_p7 }
 0xdf6   : > { %p2934_p13 = pnand %p2933_p12, %p2929_p9 }
 0xdf8   : > { %2937 = shalt.err (!%p2934_p13)
}
 0xdf9   : > { %s3763_s13 = smov 16   ;;  %s3051_s17 = smov 1   ;;  %v2172_v25 = vrot.slane %v2170_v21, 1 }
 0xdfa   : > { %s3769_s0 = scalar_lea.sflag [#allocation5], %s3606_s12  ;;  %s3770_s14 = sand.u32 1, %s3028_s22  }
 0xdfb   : > { %2841 = dma.vmem_to_hbm [thread:$0]  (%p3131_p4), %s3623_s30, 64, %s3621_s16, %s3769_s0, %s3763_s13, %s3763_s13, %s3051_s17  }
 0xdfc   : > { %s2178_s15 = scalar_lea.sflag [#allocation3], %s3770_s14  ;;  %s2938_s27 = scalar_lea.vmem %s3631_s8, 64 }
 0xdfd   : > { %p2939_p0 = scmp.ne.s32.totalorder %s3631_s8, %s2938_s27  ;;  %s3052_s18 = smov [#allocation2]  }
 0xdfe   : > { %s2942_s19 = sshll.u32 %s3052_s18, 4  ;;  %s2943_s19 = int_to_ptr.vmem [resolvable:$false] %s2942_s19 }
 0xdff   : > { %p2940_p1 = pnand %p2939_p0, %p3131_p4  ;;  %s2944_s24 = scalar_lea.vmem %s2943_s19, 128 }
 0xe00   : > { %p2945_p3 = scmp.lt.s32.totalorder %s3631_s8, %s2943_s19  ;;  %p2946_p5 = scmp.lt.s32.totalorder %s2944_s24, %s2938_s27 }
 0xe01   : > { %p2941_p2 = pneg %p2940_p1 }
 0xe02   : > { %p2947_p6 = por %p2946_p5, %p2945_p3 }
 0xe04   : > { %p2948_p7 = pnand %p2947_p6, %p2941_p2 }
 0xe06   : > { %2951 = shalt.err (!%p2948_p7)
}
 0xe07   : > { %s2952_s30 = scalar_lea.hbm %s3629_s28, 64  ;;  %s2956_s14 = scalar_lea.hbm %s3758_s4, 128 }
 0xe08   : > { %p2953_p9 = scmp.ne.s32.totalorder %s3629_s28, %s2952_s30  ;;  %p2957_p12 = scmp.lt.s32.totalorder %s3629_s28, %s3758_s4 }
 0xe09   : > { %p2958_p13 = scmp.lt.s32.totalorder %s2956_s14, %s2952_s30 }
 0xe0a   : > { %p2954_p10 = pnand %p2953_p9, %p3131_p4 }
 0xe0b   : > { %p2959_p0 = por %p2958_p13, %p2957_p12 }
 0xe0c   : > { %p2955_p11 = pneg %p2954_p10 }
 0xe0e   : > { %p2960_p1 = pnand %p2959_p0, %p2955_p11 }
 0xe10   : > { %2963 = shalt.err (!%p2960_p1)
}
 0xe11   : > { %s3771_s27 = smov 16   ;;  %v2174_v48 = vadd.f32 %v2172_v25, %v3615_v0  ;;  %s3697_s24 = scalar_lea.hbm %s3760_s6, %s3609_s20 }
 0xe12   : > { %2840 = dma.vmem_to_hbm [thread:$0]  (%p3131_p4), %s3631_s8, 64, %s3629_s28, %s2178_s15, %s3771_s27, %s3771_s27, %s3051_s17  }
 0xe13   : > { %s3772_s30 = sshll.u32 %s3390_s11, 4  ;;  %2488 = vst.msk [vmem:[%s3390_s11 + $0x3] sm:$0x1] %vm870_vm6, %v2174_v48  ;;  %s3053_s28 = smov [#allocation6]   ;;  %s3701_s30 = int_to_ptr.vmem [resolvable:$true] %s3772_s30 }
 0xe14   : > { %s2964_s16 = scalar_lea.vmem %s3701_s30, 64  ;;  %s2968_s8 = sshll.u32 %s3053_s28, 4  ;;  %s2969_s8 = int_to_ptr.vmem [resolvable:$false] %s2968_s8 }
 0xe15   : > { %p2965_p2 = scmp.ne.s32.totalorder %s3701_s30, %s2964_s16  ;;  %s2970_s15 = scalar_lea.vmem %s2969_s8, 128 }
 0xe16   : > { %p2971_p6 = scmp.lt.s32.totalorder %s3701_s30, %s2969_s8  ;;  %p2972_p7 = scmp.lt.s32.totalorder %s2970_s15, %s2964_s16 }
 0xe17   : > { %p2966_p3 = pnand %p2965_p2, %p3131_p4 }
 0xe18   : > { %p2973_p9 = por %p2972_p7, %p2971_p6 }
 0xe19   : > { %p2967_p5 = pneg %p2966_p3 }
 0xe1b   : > { %p2974_p10 = pnand %p2973_p9, %p2967_p5 }
 0xe1d   : > { %2977 = shalt.err (!%p2974_p10)
}
 0xe1e   : > { %s2978_s20 = scalar_lea.hbm %s3697_s24, 64  ;;  %s2982_s14 = scalar_lea.hbm %s3760_s6, 128 }
 0xe1f   : > { %p2979_p11 = scmp.ne.s32.totalorder %s3697_s24, %s2978_s20  ;;  %p2983_p0 = scmp.lt.s32.totalorder %s3697_s24, %s3760_s6 }
 0xe20   : > { %p2984_p1 = scmp.lt.s32.totalorder %s2982_s14, %s2978_s20 }
 0xe21   : > { %p2980_p12 = pnand %p2979_p11, %p3131_p4 }
 0xe22   : > { %p2985_p2 = por %p2984_p1, %p2983_p0 }
 0xe23   : > { %p2981_p13 = pneg %p2980_p12 }
 0xe25   : > { %p2986_p3 = pnand %p2985_p2, %p2981_p13 }
 0xe27   : > { %2989 = shalt.err (!%p2986_p3)
}
 0xe28   : > { %s3773_s19 = scalar_lea.sflag [#allocation5], %s3606_s12 }
 0xe29   : > { %2842 = dma.vmem_to_hbm [thread:$0]  (%p3131_p4), %s3701_s30, 64, %s3697_s24, %s3773_s19, %s3771_s27, %s3771_s27, %s3051_s17  }
 0xe2a PF: > { %p2856_p5 = scmp.ge.s32.totalorder %s3044_s26, 2  ;;  %s2251_s16 = sand.u32 1, %s3024_s21  }
 0xe2b   : > { %s2252_s28 = scalar_lea.sflag [#allocation3], %s2251_s16 }
 0xe2c   : > { %p2847_p6 = pnand %p2856_p5, %p3140_p8 }
 0xe2e   : > { %p2848_p7 = pneg %p2847_p6 }
 0xe30   : > { %3015 = dma.done.wait (%p2848_p7), %s2252_s28, 64  }
 0xe31   : > { %3017 = vsyncadd (%p2848_p7), %s2252_s28, 4294967232  ;;  %s3774_s7 = sadd.s32 4294967294, %s3044_s26  }
 0xe32   : > { %s2260_s8 = sand.u32 1, %s3774_s7  }
 0xe33   : > { %s2261_s15 = scalar_lea.sflag [#allocation5], %s2260_s8 }
 0xe34   : > { %3019 = dma.done.wait (%p2848_p7), %s2261_s15, 128  }
 0xe35   : > { %3021 = vsyncadd (%p2848_p7), %s2261_s15, 4294967168  ;;  %s23_s26 = sadd.s32 1, %s3044_s26   ;;  %s3775_s21 = smov %s3028_s22 }
 0xe36   : > { %p20_p4 = scmp.ge.s32.totalorder %s23_s26, 4   ;;  %s3776_s22 = smov %s3032_s23 }
 0xe37   : > { %s3777_s23 = smov %s3146_s10  ;;  %s3778_s24 = smov %s3040_s25 }
 0xe38   : > { %s3779_s25 = smov %s3781_s29  ;;  %22 = sbr.rel (!%p20_p4) target bundleno = 8 (0x8), region = 121 }
 0xe3d   :  { %2275 = vsyncpa [#allocation3], 1 }
 0xe3e   :  { %2277 = vsyncpa [#allocation3 + $0x1], 1 }
 0xe3f   :  { %2278 = vsyncpa [#allocation5], 1 }
 0xe40   :  { %2280 = vsyncpa [#allocation5 + $0x1], 1 }

</bundles_post_ra>
